<compile_context>
chip_gen: v7x
topology: tpu7x:2x2x1
jax: 0.10.0
libtpu: 0.0.40
codegen_flags: <defaults>
</compile_context>

<pallas_src>
import functools

import jax
import jax.numpy as jnp
from jax.experimental import pallas as pl
from jax.experimental.pallas import tpu as pltpu


def _label_prop_kernel(a_ref, norm_ref, post_ref, lab_ref, z0_hbm, out_ref,
                       z_scr, zn_scr, init_sem, *, alpha: float, block_rows: int):
    """One (layer, row-tile) grid step of label propagation.

    a_ref    : (block_rows, N)     int8  per-row-scaled adjacency rows
    norm_ref : (block_rows, 1)     f32   norm = D^{-1/2} for this row tile
    post_ref : (block_rows, 1)     f32   alpha * norm * row_scale (dequant folded)
    lab_ref  : (block_rows, C_pad) f32   pre-masked one-hot labels for this tile
    z0_hbm   : (N, C_pad)          f32   norm * masked labels, raw HBM ref (ANY)
    out_ref  : (block_rows, C_pad) f32   output tile (written on last layer only)
    z_scr    : (N, C_pad)          f32   carried state z = norm * y
    zn_scr   : (N, C_pad)          bf16  per-layer snapshot of z (matmul operand)
    init_sem : ()                  DMA semaphore for the one-time z0 copy
    """
    layer = pl.program_id(0)
    tile = pl.program_id(1)

    # One-time init: DMA z0 (HBM) into the f32 VMEM carry. No resident y0 block.
    @pl.when(jnp.logical_and(layer == 0, tile == 0))
    def _init():
        cp = pltpu.make_async_copy(z0_hbm, z_scr, init_sem)
        cp.start()
        cp.wait()

    # Once per layer: snapshot the carry in bf16 as this layer's matmul RHS, so
    # the in-place per-tile updates below never corrupt later tiles' input.
    @pl.when(tile == 0)
    def _snapshot():
        zn_scr[...] = z_scr[...].astype(jnp.bfloat16)

    # MXU: rows of A @ (norm * y).  int8 -> bf16 upcast in VMEM (the integer
    # values 0..127 are exact in bf16); f32 accumulate on the MXU.
    a = a_ref[...].astype(jnp.bfloat16)
    h = jnp.dot(a, zn_scr[...], preferred_element_type=jnp.float32)

    row0 = pl.multiple_of(tile * block_rows, block_rows)
    rows = pl.ds(row0, block_rows)

    norm = norm_ref[...]                      # (block_rows, 1)
    y = z_scr[rows, :] * (1.0 / norm)         # recover y from the carried z

    # y' = (1-alpha) * y + alpha * norm * (row_scale * h)
    y = (1.0 - alpha) * y + post_ref[...] * h

    # F.normalize(y, p=1, dim=1) — exact f32 divide (off the DMA-bound path).
    denom = jnp.maximum(jnp.sum(jnp.abs(y), axis=1, keepdims=True), 1e-12)
    y = y * (1.0 / denom)

    # y[mask] = labels[mask].  lab_ref is pre-masked one-hot, so its row sum is
    # exactly the {0,1} labelled-node indicator (no separate mask input).
    lab = lab_ref[...]
    m = jnp.sum(lab, axis=1, keepdims=True)
    y = lab + (1.0 - m) * y

    z_scr[rows, :] = y * norm                 # carry for the next layer

    @pl.when(layer == pl.num_programs(0) - 1)
    def _emit():
        out_ref[...] = y                      # only the last layer's y is the answer


def _vmem_capacity_bytes():
    try:
        return int(pltpu.get_tpu_info().vmem_capacity_bytes)
    except Exception:
        return 64 << 20          # conservative fallback (v7x per-core VMEM)


def _default_block_rows(n, c_pad):
    budget = int(_vmem_capacity_bytes() * 0.6)
    fixed = n * c_pad * 6        # f32 carry + bf16 snapshot
    for b in (512, 256, 128, 64, 32, 16, 8):
        if n % b == 0 and 2 * b * n + fixed <= budget:
            return b
    return min(n, 8)


def label_propagation(adj, labels_int, mask_bool, *, num_layers=3, alpha=0.9,
                      num_classes=None, block_rows=None):
    """JAX/Pallas equivalent of LabelPropagation.forward.

    adj:        (N, N) adjacency, adj[v, u] != 0 iff edge u -> v (0/1 expected,
                as implied by DGL copy_u/sum; weighted rows are per-row-scale
                quantized to int8).
    labels_int: (N,)   int32 class ids
    mask_bool:  (N,)   bool, True where the label is observed
    returns     (N, C) float32 propagated label distribution
    """
    n = adj.shape[0]
    if num_classes is None:
        # NOTE: host sync; pass num_classes explicitly when calling under jit.
        num_classes = int(labels_int.max()) + 1
    c_pad = pl.cdiv(num_classes, 128) * 128    # lane-dense class dimension

    if block_rows is None:
        block_rows = _default_block_rows(n, c_pad)
    assert n % block_rows == 0 and block_rows % 8 == 0

    # Masked one-hot labels, zero-padded along the class dimension.
    labels_oh = jax.nn.one_hot(labels_int, num_classes, dtype=jnp.float32)
    labels_oh = jnp.pad(labels_oh, ((0, 0), (0, c_pad - num_classes)))
    mask_f = mask_bool.astype(jnp.float32)[:, None]           # (N, 1)
    labels_masked = labels_oh * mask_f                        # y[mask] = labels[mask]

    if num_layers == 0:
        return labels_masked[:, :num_classes]

    adj_f32 = adj.astype(jnp.float32)
    degs = jnp.clip(jnp.sum(adj_f32, axis=1), 1.0, None)      # in-degrees, >= 1
    norm = jnp.power(degs, -0.5)                              # D^{-1/2}

    # Per-row-scale int8 quantization of the raw adjacency (exact for 0/1 rows).
    row_max = jnp.max(jnp.abs(adj_f32), axis=1)
    row_max = jnp.where(row_max > 0.0, row_max, 1.0)
    a_q = jnp.round(adj_f32 * (127.0 / row_max)[:, None]).astype(jnp.int8)

    norm_col = norm[:, None].astype(jnp.float32)                          # (N, 1)
    post_col = (alpha * norm * row_max / 127.0)[:, None].astype(jnp.float32)
    z0 = (labels_masked * norm_col).astype(jnp.float32)        # initial carry

    kernel = functools.partial(_label_prop_kernel,
                               alpha=float(alpha), block_rows=int(block_rows))
    num_tiles = n // block_rows

    # Scoped-VMEM budget: requirement * 1.2, never below it, capped at ~85% of
    # the detected per-core capacity (no hard 48 MiB clamp).
    vmem_est = (
        2 * block_rows * n * 1                # int8 A stripe, double-buffered
        + 2 * 2 * block_rows * 128 * 4        # two (block_rows,1) columns (lane-padded)
        + 2 * block_rows * c_pad * 4          # labels tile
        + 2 * block_rows * c_pad * 4          # output tile
        + n * c_pad * 4                       # z carry (f32)
        + n * c_pad * 2                       # per-layer bf16 snapshot
    )
    vmem_cap = _vmem_capacity_bytes()
    vmem_limit = max(int(vmem_est * 1.2) + (1 << 20), 32 << 20)
    vmem_limit = min(vmem_limit, int(vmem_cap * 0.85))
    vmem_limit = max(vmem_limit, int(vmem_est * 1.2))          # never below need

    cost = pl.CostEstimate(
        flops=2 * num_layers * n * n * c_pad + 10 * num_layers * n * c_pad,
        transcendentals=2 * num_layers * n,
        bytes_accessed=num_layers * (n * n + n * c_pad * 4 + n * 8)
        + 2 * n * c_pad * 4,
    )

    out = pl.pallas_call(
        kernel,
        out_shape=jax.ShapeDtypeStruct((n, c_pad), jnp.float32),
        grid_spec=pltpu.PrefetchScalarGridSpec(
            num_scalar_prefetch=0,
            grid=(num_layers, num_tiles),
            in_specs=[
                pl.BlockSpec((block_rows, n), lambda l, i: (i, 0)),      # int8 A rows
                pl.BlockSpec((block_rows, 1), lambda l, i: (i, 0)),      # norm
                pl.BlockSpec((block_rows, 1), lambda l, i: (i, 0)),      # alpha*norm*scale
                pl.BlockSpec((block_rows, c_pad), lambda l, i: (i, 0)),  # masked labels
                pl.BlockSpec(memory_space=pl.ANY),                       # z0 (HBM, init DMA)
            ],
            out_specs=pl.BlockSpec((block_rows, c_pad), lambda l, i: (i, 0)),
            scratch_shapes=[
                pltpu.VMEM((n, c_pad), jnp.float32),      # z carry
                pltpu.VMEM((n, c_pad), jnp.bfloat16),     # per-layer bf16 snapshot
                pltpu.SemaphoreType.DMA(()),              # init DMA semaphore
            ],
        ),
        compiler_params=pltpu.CompilerParams(
            dimension_semantics=("arbitrary", "arbitrary"),
            vmem_limit_bytes=int(vmem_limit),
        ),
        cost_estimate=cost,
    )(a_q, norm_col, post_col, labels_masked, z0)
    return out[:, :num_classes]


def _reference(adj, labels_int, mask_bool, *, num_layers, alpha, num_classes):
    """Pure-JAX reference mirroring the PyTorch code line-by-line (f32)."""
    labels = jax.nn.one_hot(labels_int, num_classes, dtype=jnp.float32)
    y = jnp.where(mask_bool[:, None], labels, 0.0)
    last = (1.0 - alpha) * y
    degs = jnp.clip(jnp.sum(adj, axis=1), 1.0, None)
    norm = jnp.power(degs, -0.5)[:, None]
    for _ in range(num_layers):
        h = adj @ (y * norm)
        y = last + alpha * h * norm
        y = y / jnp.maximum(jnp.sum(jnp.abs(y), axis=1, keepdims=True), 1e-12)
        y = jnp.where(mask_bool[:, None], labels, y)
        last = (1.0 - alpha) * y
    return y


if __name__ == "__main__":
    key = jax.random.PRNGKey(0)
    k_adj, k_lab, k_mask = jax.random.split(key, 3)

    N = 256            # nodes
    C = 8              # classes
    NUM_LAYERS = 3
    ALPHA = 0.9

    # Random sparse-ish directed graph as a dense 0/1 adjacency.
    adj = (jax.random.uniform(k_adj, (N, N)) < 0.05).astype(jnp.float32)
    labels_int = jax.random.randint(k_lab, (N,), 0, C, dtype=jnp.int32)
    mask_bool = jax.random.uniform(k_mask, (N,)) < 0.3   # ~30% labelled nodes

    y_out = label_propagation(adj, labels_int, mask_bool,
                              num_layers=NUM_LAYERS, alpha=ALPHA,
                              num_classes=C, block_rows=128)
    y_out = jax.block_until_ready(y_out)

    y_ref = _reference(adj, labels_int, mask_bool,
                       num_layers=NUM_LAYERS, alpha=ALPHA, num_classes=C)
    assert y_out.shape == (N, C)
    # int8 adjacency is exact for a 0/1 graph; the only low-precision operand is
    # the bf16 z snapshot feeding the MXU (~4e-3 relative), so 1e-2 has margin.
    assert jnp.allclose(y_out, y_ref, atol=1e-2, rtol=1e-2)
    print("KERNEL_OK")
</pallas_src>

<mosaic_0001>
module attributes {stable_mosaic.version = 11 : i64} {
  func.func @_label_prop_kernel(%arg0: i32, %arg1: i32, %arg2: memref<128x256xi8, #tpu.memory_space<vmem>>, %arg3: memref<128x1xf32, #tpu.memory_space<vmem>>, %arg4: memref<128x1xf32, #tpu.memory_space<vmem>>, %arg5: memref<128x128xf32, #tpu.memory_space<vmem>>, %arg6: memref<256x128xf32, #tpu.memory_space<any>>, %arg7: memref<128x128xf32, #tpu.memory_space<vmem>>, %arg8: memref<256x128xf32, #tpu.memory_space<vmem>>, %arg9: memref<256x128xbf16, #tpu.memory_space<vmem>>, %arg10: memref<!tpu.dma_semaphore, #tpu.memory_space<semaphore_mem>>) attributes {dimension_semantics = [#tpu.dimension_semantics<arbitrary>, #tpu.dimension_semantics<arbitrary>], iteration_bounds = array<i64: 3, 2>, scalar_prefetch = 0 : i64, scratch_operands = 3 : i64, tpu.core_type = #tpu.core_type<tc>, window_params = [{transform_indices = @transform_0, window_bounds = array<i64: 128, 256>}, {transform_indices = @transform_1, window_bounds = array<i64: 128, 1>}, {transform_indices = @transform_2, window_bounds = array<i64: 128, 1>}, {transform_indices = @transform_3, window_bounds = array<i64: 128, 128>}, {}, {transform_indices = @transform_5, window_bounds = array<i64: 128, 128>}]} {
    %c0_i32 = arith.constant 0 : i32
    %0 = arith.cmpi eq, %arg0, %c0_i32 : i32
    %c0_i32_0 = arith.constant 0 : i32
    %1 = arith.cmpi eq, %arg1, %c0_i32_0 : i32
    %2 = arith.andi %0, %1 : i1
    %3 = arith.extui %2 : i1 to i32
    %c0_i32_1 = arith.constant 0 : i32
    %4 = arith.cmpi ne, %3, %c0_i32_1 : i32
    scf.if %4 {
      tpu.enqueue_dma source(%arg6 : memref<256x128xf32, #tpu.memory_space<any>>) target(%arg8 : memref<256x128xf32, #tpu.memory_space<vmem>>) target_semaphore(%arg10 : memref<!tpu.dma_semaphore, #tpu.memory_space<semaphore_mem>>)
      tpu.wait_dma2 semaphore(%arg10 : memref<!tpu.dma_semaphore, #tpu.memory_space<semaphore_mem>>) src(%arg6 : memref<256x128xf32, #tpu.memory_space<any>>) dst(%arg8 : memref<256x128xf32, #tpu.memory_space<vmem>>)
    } else {
    }
    %c0_i32_2 = arith.constant 0 : i32
    %5 = arith.cmpi eq, %arg1, %c0_i32_2 : i32
    %6 = arith.extui %5 : i1 to i32
    %c0_i32_3 = arith.constant 0 : i32
    %7 = arith.cmpi ne, %6, %c0_i32_3 : i32
    scf.if %7 {
      %c0_23 = arith.constant 0 : index
      %c0_24 = arith.constant 0 : index
      %51 = vector.load %arg8[%c0_23, %c0_24] : memref<256x128xf32, #tpu.memory_space<vmem>>, vector<256x128xf32>
      %52 = arith.truncf %51 : vector<256x128xf32> to vector<256x128xbf16>
      %c0_25 = arith.constant 0 : index
      %c0_26 = arith.constant 0 : index
      %53 = vector.load %arg9[%c0_25, %c0_26] : memref<256x128xbf16, #tpu.memory_space<vmem>>, vector<256x128xbf16>
      tpu.vector_store %arg9[%c0_25, %c0_26], %52 {strides = array<i32>} : memref<256x128xbf16, #tpu.memory_space<vmem>>, vector<256x128xbf16>,
    } else {
    }
    %c0 = arith.constant 0 : index
    %c0_4 = arith.constant 0 : index
    %8 = vector.load %arg2[%c0, %c0_4] : memref<128x256xi8, #tpu.memory_space<vmem>>, vector<128x256xi8>
    %9 = arith.sitofp %8 : vector<128x256xi8> to vector<128x256xbf16>
    %c0_5 = arith.constant 0 : index
    %c0_6 = arith.constant 0 : index
    %10 = vector.load %arg9[%c0_5, %c0_6] : memref<256x128xbf16, #tpu.memory_space<vmem>>, vector<256x128xbf16>
    %cst = arith.constant dense<0.000000e+00> : vector<128x128xf32>
    %11 = tpu.matmul %9, %10, %cst {dimension_numbers = #tpu.dot_dimension_numbers<[1], [0], [0], [1], [0, 0, 1, 1], [], []>} : vector<128x256xbf16>, vector<256x128xbf16>, vector<128x128xf32> -> vector<128x128xf32>
    %c128_i32 = arith.constant 128 : i32
    %12 = arith.muli %arg1, %c128_i32 : i32
    %13 = tpu.assume_multiple %12, 128 : i32
    %c0_7 = arith.constant 0 : index
    %c0_8 = arith.constant 0 : index
    %14 = vector.load %arg3[%c0_7, %c0_8] : memref<128x1xf32, #tpu.memory_space<vmem>>, vector<128x1xf32>
    %15 = arith.index_cast %13 : i32 to index
    %c0_9 = arith.constant 0 : index
    %16 = vector.load %arg8[%15, %c0_9] : memref<256x128xf32, #tpu.memory_space<vmem>>, vector<128x128xf32>
    %cst_10 = arith.constant 1.000000e+00 : f32
    %17 = vector.broadcast %cst_10 : f32 to vector<128x1xf32>
    %18 = arith.divf %17, %14 : vector<128x1xf32>
    %19 = vector.broadcast %18 : vector<128x1xf32> to vector<128x128xf32>
    %20 = arith.mulf %16, %19 : vector<128x128xf32>
    %cst_11 = arith.constant 1.000000e-01 : f32
    %21 = vector.broadcast %cst_11 : f32 to vector<128x128xf32>
    %22 = arith.mulf %21, %20 : vector<128x128xf32>
    %c0_12 = arith.constant 0 : index
    %c0_13 = arith.constant 0 : index
    %23 = vector.load %arg4[%c0_12, %c0_13] : memref<128x1xf32, #tpu.memory_space<vmem>>, vector<128x1xf32>
    %24 = vector.broadcast %23 : vector<128x1xf32> to vector<128x128xf32>
    %25 = arith.mulf %24, %11 : vector<128x128xf32>
    %26 = arith.addf %22, %25 : vector<128x128xf32>
    %27 = math.absf %26 : vector<128x128xf32>
    %cst_14 = arith.constant dense<0.000000e+00> : vector<128xf32>
    %28 = vector.multi_reduction <add>, %27, %cst_14 [1] : vector<128x128xf32> to vector<128xf32>
    %29 = vector.shape_cast %28 : vector<128xf32> to vector<128x1xf32>
    %cst_15 = arith.constant 9.99999996E-13 : f32
    %30 = vector.broadcast %cst_15 : f32 to vector<128x1xf32>
    %31 = arith.maximumf %29, %30 : vector<128x1xf32>
    %cst_16 = arith.constant 1.000000e+00 : f32
    %32 = vector.broadcast %cst_16 : f32 to vector<128x1xf32>
    %33 = arith.divf %32, %31 : vector<128x1xf32>
    %34 = vector.broadcast %33 : vector<128x1xf32> to vector<128x128xf32>
    %35 = arith.mulf %26, %34 : vector<128x128xf32>
    %c0_17 = arith.constant 0 : index
    %c0_18 = arith.constant 0 : index
    %36 = vector.load %arg5[%c0_17, %c0_18] : memref<128x128xf32, #tpu.memory_space<vmem>>, vector<128x128xf32>
    %cst_19 = arith.constant dense<0.000000e+00> : vector<128xf32>
    %37 = vector.multi_reduction <add>, %36, %cst_19 [1] : vector<128x128xf32> to vector<128xf32>
    %38 = vector.shape_cast %37 : vector<128xf32> to vector<128x1xf32>
    %cst_20 = arith.constant 1.000000e+00 : f32
    %39 = vector.broadcast %cst_20 : f32 to vector<128x1xf32>
    %40 = arith.subf %39, %38 : vector<128x1xf32>
    %41 = vector.broadcast %40 : vector<128x1xf32> to vector<128x128xf32>
    %42 = arith.mulf %41, %35 : vector<128x128xf32>
    %43 = arith.addf %36, %42 : vector<128x128xf32>
    %44 = vector.broadcast %14 : vector<128x1xf32> to vector<128x128xf32>
    %45 = arith.mulf %43, %44 : vector<128x128xf32>
    %46 = arith.index_cast %13 : i32 to index
    %c0_21 = arith.constant 0 : index
    %47 = vector.load %arg8[%46, %c0_21] : memref<256x128xf32, #tpu.memory_space<vmem>>, vector<128x128xf32>
    tpu.vector_store %arg8[%46, %c0_21], %45 {strides = array<i32>} : memref<256x128xf32, #tpu.memory_space<vmem>>, vector<128x128xf32>,
    %c2_i32 = arith.constant 2 : i32
    %48 = arith.cmpi eq, %arg0, %c2_i32 : i32
    %49 = arith.extui %48 : i1 to i32
    %c0_i32_22 = arith.constant 0 : i32
    %50 = arith.cmpi ne, %49, %c0_i32_22 : i32
    scf.if %50 {
      %c0_23 = arith.constant 0 : index
      %c0_24 = arith.constant 0 : index
      %51 = vector.load %arg7[%c0_23, %c0_24] : memref<128x128xf32, #tpu.memory_space<vmem>>, vector<128x128xf32>
      tpu.vector_store %arg7[%c0_23, %c0_24], %43 {strides = array<i32>} : memref<128x128xf32, #tpu.memory_space<vmem>>, vector<128x128xf32>,
    } else {
    }
    return
  }
  func.func @transform_0(%arg0: i32, %arg1: i32) -> (i32, i32) {
    %c0_i32 = arith.constant 0 : i32
    %c0_i32_0 = arith.constant 0 : i32
    return %arg1, %c0_i32 : i32, i32
  }
  func.func @transform_1(%arg0: i32, %arg1: i32) -> (i32, i32) {
    %c0_i32 = arith.constant 0 : i32
    %c0_i32_0 = arith.constant 0 : i32
    return %arg1, %c0_i32 : i32, i32
  }
  func.func @transform_2(%arg0: i32, %arg1: i32) -> (i32, i32) {
    %c0_i32 = arith.constant 0 : i32
    %c0_i32_0 = arith.constant 0 : i32
    return %arg1, %c0_i32 : i32, i32
  }
  func.func @transform_3(%arg0: i32, %arg1: i32) -> (i32, i32) {
    %c0_i32 = arith.constant 0 : i32
    %c0_i32_0 = arith.constant 0 : i32
    return %arg1, %c0_i32 : i32, i32
  }
  func.func @transform_5(%arg0: i32, %arg1: i32) -> (i32, i32) {
    %c0_i32 = arith.constant 0 : i32
    %c0_i32_0 = arith.constant 0 : i32
    return %arg1, %c0_i32 : i32, i32
  }
}

</mosaic_0001>

<bundles_post_ra>
// kernel: tpu_custom_call.1
= control target key start
LH: loop header
LB: loop body
LE: loop exit
PB: predicated region body
PF: predicated region fallthrough
CT: control target
= control target key end

     0   :  { %s2615_s0 = inlined_call_operand.hbm [shape: s8[256,256], index: 0, kind: input, shape index: {}]   ;;  %s2616_s1 = inlined_call_operand.vmem [shape: f32[256,1], index: 1, kind: input, shape index: {}]   ;;  %s2617_s2 = inlined_call_operand.vmem [shape: f32[256,1], index: 2, kind: input, shape index: {}]   ;;  %s2618_s3 = inlined_call_operand.vmem [shape: f32[256,128], index: 3, kind: input, shape index: {}]   ;;  %s2619_s4 = inlined_call_operand.vmem [shape: f32[256,128], index: 4, kind: input, shape index: {}]   ;;  %s2620_s5 = inlined_call_operand.hbm [shape: f32[256,128], index: 5, kind: output, shape index: {}]  }
   0x1   :  { %2626 = sst [smem:[#allocation26_spill]] %s2615_s0 }
   0x2   :  { %2627 = sst [smem:[#allocation27_spill]] %s2616_s1 }
   0x3   :  { %10 = vsyncpa [#allocation6], 0 }
   0x4   :  { %12 = vsyncpa [#allocation6 + $0x1], 0 }
   0x5   :  { %13 = vsyncpa [#allocation7], 0 }
   0x6   :  { %15 = vsyncpa [#allocation7 + $0x1], 0  ;;  %s1849_s18 = smov 0   ;;  %s1851_s19 = smov 0  }
   0x7   :  { %s1853_s20 = smov 0   ;;  %s1855_s21 = smov 0  }
   0x8   :  { %s1857_s22 = smov 0   ;;  %s1859_s23 = smov 0  }
   0x9   :  { %s1861_s24 = smov 0   ;;  %s1863_s25 = smov 0  }
   0xa LB: > { %2628 = sst [smem:[#allocation13_spill]] %s1806_s24  ;;  %s1412_s26 = sadd.s32 4294967295, %s1810_s25   ;;  %s1810_s25 = sphi %s1863_s25, %s21_s25   ;;  %s1806_s24 = sphi %s1861_s24, %s2663_s24   ;;  %s1802_s23 = sphi %s1859_s23, %s2668_s23   ;;  %s1798_s22 = sphi %s1857_s22, %s2661_s22   ;;  %s1794_s21 = sphi %s1855_s21, %s2667_s21   ;;  %s1790_s20 = sphi %s1853_s20, %s2666_s20   ;;  %s1786_s19 = sphi %s1851_s19, %s2665_s19   ;;  %s1782_s18 = sphi %s1849_s18, %s2664_s18  }
   0xb   : > { %s1413_s27 = sadd.s32 4294967294, %s1810_s25   ;;  %s30_s28 = sadd.s32 1, %s1802_s23 }
   0xc   : > { %s33_s29 = sadd.s32 1, %s1806_s24  ;;  %p31_p0 = scmp.ge.s32.totalorder %s30_s28, 2 }
   0xd   : > { %s40_s30 = sadd.s32 1, %s1790_s20  ;;  %p47_p1 = scmp.ne.s32.totalorder %s1790_s20, %s1786_s19 }
   0xe   : > { %p48_p2 = scmp.eq.s32.totalorder %s1810_s25, 0  ;;  %s2670_s28 = smov (%p31_p0, %s30_s28), 0 }
   0xf   : > { %2629 = sst [smem:[#allocation14_spill]] %s2670_s28  ;;  %s2672_s29 = smov (!%p31_p0, %s33_s29), %s1806_s24 }
  0x10   : > { %s37_s6 = ssub.s32 %s1802_s23, %s2670_s28  ;;  %p1905_p3 = por %p48_p2, %p47_p1 }
  0x11   : > { %p35_p4 = scmp.ge.s32.totalorder %s2672_s29, 3  ;;  %p38_p5 = scmp.eq.s32.totalorder %s37_s6, 0 }
  0x12   : > { %p53_p6 = scmp.ne.s32.totalorder %s1786_s19, %s1782_s18  ;;  %p54_p7 = scmp.eq.s32.totalorder %s1412_s26, 0 }
  0x13   : > { %s2674_s29 = smov (%p35_p4, %s2672_s29), 0  ;;  %p155_p9 = scmp.eq.s32.totalorder %s1412_s26, 5 }
  0x14   : > { %2631 = sst [smem:[#allocation15_spill]] %s2674_s29  ;;  %p1916_p8 = por %p54_p7, %p53_p6 }
  0x15   : > { %s1914_s8 = scalar_select %p38_p5, %s1790_s20, %s40_s30  }
  0x16   : > { %p161_p10 = scmp.eq.s32.totalorder %s1413_s27, 5  ;;  %p1923_p11 = por %p155_p9, %p47_p1 }
  0x17   : > { %p1533_p12 = scmp.lt.s32.totalorder %s1810_s25, 6  ;;  %s181_s12 = sand.u32 1, %s1790_s20  }
  0x18   : > { %s2633_s10 = scalar_select %p1923_p11, 1, 0 }
  0x19   : > { %p1928_p13 = por %p161_p10, %p53_p6  ;;  %s1416_s13 = sshll.u32 %s181_s12, 6 }
  0x1a   : > { %s1439_s14 = sshll.u32 %s1802_s23, 10  ;;  %s2635_s0 = sld [smem:[#allocation26_spill]] }
  0x1b   : > { %s2634_s11 = scalar_select %p1928_p13, 1, 0 }
  0x1c   : > { %s185_s26 = scalar_lea.vmem [#allocation5], %s1416_s13  ;;  %p1943_p0 = pnand %p1533_p12, %p1905_p3 }
  0x1d   : > { %s193_s27 = sshll.u32 %s185_s26, 4  ;;  %s1948_s6 = scalar_lea.sflag [#allocation6], %s181_s12  ;;  %s1939_s27 = int_to_ptr.vmem [resolvable:$true] %s193_s27 }
  0x1e   : > { %p1682_p4 = pneg %p1943_p0 }
  0x20   : > { %s1937_s17 = scalar_lea.hbm %s2635_s0, %s1439_s14  ;;  %s1685_s7 = scalar_lea.hbm %s2635_s0, 2048 }
  0x21   : > { %s1680_s14 = scalar_lea.hbm %s1937_s17, 1024  ;;  %p1686_p3 = scmp.lt.u32.totalorder %s1937_s17, %s2635_s0 }
  0x22   : > { %p1681_p2 = scmp.ne.s32.totalorder %s1937_s17, %s1680_s14  ;;  %p1687_p7 = scmp.lt.u32.totalorder %s1685_s7, %s1680_s14 }
  0x23   : > { %p1689_p10 = scmp.lt.u32.totalorder %s1680_s14, %s1937_s17 }
  0x24   : > { %p1683_p5 = pnand %p1682_p4, %p1681_p2  ;;  %p1688_p9 = por %p1687_p7, %p1686_p3 }
  0x26   : > { %p1684_p6 = pneg %p1683_p5  ;;  %p1690_p12 = por %p1689_p10, %p1688_p9 }
  0x28   : > { %p1691_p1 = pnand %p1690_p12, %p1684_p6 }
  0x2a   : > { %1694 = shalt.err (!%p1691_p1)
}
  0x2b   : > { %s1695_s12 = scalar_lea.vmem %s1939_s27, 1024  ;;  %s1812_s13 = smov [#allocation5]  }
  0x2c   : > { %p1696_p2 = scmp.ne.s32.totalorder %s1939_s27, %s1695_s12  ;;  %s1700_s15 = sshll.u32 %s1812_s13, 4  ;;  %s1701_s15 = int_to_ptr.vmem [resolvable:$false] %s1700_s15 }
  0x2d   : > { %s1702_s16 = scalar_lea.vmem %s1701_s15, 2048  ;;  %p1703_p11 = scmp.lt.s32.totalorder %s1939_s27, %s1701_s15 }
  0x2e   : > { %p1698_p5 = pnand %p1696_p2, %p1682_p4  ;;  %p1704_p3 = scmp.lt.s32.totalorder %s1702_s16, %s1695_s12 }
  0x30   : > { %p1699_p13 = pneg %p1698_p5  ;;  %p1705_p7 = por %p1704_p3, %p1703_p11 }
  0x32   : > { %p1706_p9 = pnand %p1705_p7, %p1699_p13 }
  0x34   : > { %1709 = shalt.err (!%p1706_p9)
}
  0x35   : > { %s1813_s14 = smov 256   ;;  %s1814_s7 = smov 16  }
  0x36   : > { %1528 = dma.hbm_to_vmem [thread:$0]  (!%p1943_p0), %s1937_s17, 1024, %s1939_s27, %s1948_s6, %s1813_s14, %s1813_s14, %s1814_s7  }
  0x37   : > { %p228_p1 = scmp.lt.s32.totalorder %s1810_s25, 7  ;;  %p2637_p4 = scmp.ge.s32.totalorder %s1810_s25, 1 }
  0x39   : > { %p229_p6 = pnand %p2637_p4, %p228_p1 }
  0x3b   : > { %232 = sbr.rel (%p229_p6) target bundleno = 588 (0x24c), region = 36 }
  0x42   : > { %s1980_s26 = sand.u32 1, %s1786_s19  }
  0x43   : > { %s1421_s12 = sshll.u32 %s1980_s26, 6  ;;  %s235_s13 = scalar_lea.sflag [#allocation6], %s1980_s26 }
  0x44   : > { %s1984_s15 = scalar_lea.vmem [#allocation5], %s1421_s12 }
  0x45   : > { %1771 = dma.done.wait (%p1916_p8), %s235_s13, 1024  }
  0x46   : > { %1773 = vsyncadd (%p1916_p8), %s235_s13, 4294966272  ;;  %s1422_s17 = sshll.u32 %s1980_s26, 7  ;;  %s1423_s27 = sshll.u32 %s1794_s21, 4 }
  0x47   : > { %p280_p11 = scmp.lt.s32.totalorder %s1423_s27, 31  ;;  %p299_p13 = scmp.eq.s32.totalorder %s1798_s22, 0 }
  0x48   : > { %p300_p0 = scmp.eq.s32.totalorder %s1794_s21, 0  ;;  %s2638_s1 = sld [smem:[#allocation27_spill]] }
  0x49   : > { %s2676_s27 = smov (!%p280_p11, %s1423_s27), 31  ;;  %s2009_s28 = scalar_lea.vmem [#allocation8], %s1422_s17 }
  0x4a   : > { %p301_p10 = pnand %p300_p0, %p299_p13  ;;  %s1424_s30 = sshll.u32 %s2676_s27, 3 }
  0x4b   : > { %s2002_s12 = scalar_lea.vmem %s2617_s2, %s1424_s30  ;;  %s2007_s29 = scalar_lea.vmem %s2618_s3, %s1424_s30  ;;  %v337_v0 = vld [vmem:[%s2619_s4] sm:$0xff] (!%p301_p10)  ;;  %v339_v1 = vld [vmem:[%s2619_s4 + $0x8] sm:$0xff] (!%p301_p10)  ;;  %v341_v2 = vld [vmem:[%s2619_s4 + $0x10] sm:$0xff] (!%p301_p10) }
  0x4c   : > { %304 = sbr.rel (%p301_p10) target bundleno = 95 (0x5f), region = 44  ;;  %338 = vst [vmem:[#allocation2] sm:$0xff] (!%p301_p10), %v337_v0  ;;  %340 = vst [vmem:[#allocation2 + $0x8] sm:$0xff] (!%p301_p10), %v339_v1  ;;  %v343_v3 = vld [vmem:[%s2619_s4 + $0x18] sm:$0xff] (!%p301_p10)  ;;  %v345_v4 = vld [vmem:[%s2619_s4 + $0x20] sm:$0xff] (!%p301_p10) }
  0x4d   : > { %342 = vst [vmem:[#allocation2 + $0x10] sm:$0xff] (!%p301_p10), %v341_v2  ;;  %v347_v5 = vld [vmem:[%s2619_s4 + $0x28] sm:$0xff] (!%p301_p10)  ;;  %344 = vst [vmem:[#allocation2 + $0x18] sm:$0xff] (!%p301_p10), %v343_v3  ;;  %v349_v6 = vld [vmem:[%s2619_s4 + $0x30] sm:$0xff] (!%p301_p10) }
  0x4e   : > { %s1997_s14 = scalar_lea.vmem %s2638_s1, %s1424_s30  ;;  %346 = vst [vmem:[#allocation2 + $0x20] sm:$0xff] (!%p301_p10), %v345_v4  ;;  %348 = vst [vmem:[#allocation2 + $0x28] sm:$0xff] (!%p301_p10), %v347_v5  ;;  %v351_v7 = vld [vmem:[%s2619_s4 + $0x38] sm:$0xff] (!%p301_p10)  ;;  %v353_v8 = vld [vmem:[%s2619_s4 + $0x40] sm:$0xff] (!%p301_p10) }
  0x4f   : > { %350 = vst [vmem:[#allocation2 + $0x30] sm:$0xff] (!%p301_p10), %v349_v6  ;;  %352 = vst [vmem:[#allocation2 + $0x38] sm:$0xff] (!%p301_p10), %v351_v7  ;;  %v355_v9 = vld [vmem:[%s2619_s4 + $0x48] sm:$0xff] (!%p301_p10)  ;;  %v357_v10 = vld [vmem:[%s2619_s4 + $0x50] sm:$0xff] (!%p301_p10) }
  0x50   : > { %354 = vst [vmem:[#allocation2 + $0x40] sm:$0xff] (!%p301_p10), %v353_v8  ;;  %v359_v11 = vld [vmem:[%s2619_s4 + $0x58] sm:$0xff] (!%p301_p10)  ;;  %356 = vst [vmem:[#allocation2 + $0x48] sm:$0xff] (!%p301_p10), %v355_v9  ;;  %v361_v12 = vld [vmem:[%s2619_s4 + $0x60] sm:$0xff] (!%p301_p10) }
  0x51   : > { %358 = vst [vmem:[#allocation2 + $0x50] sm:$0xff] (!%p301_p10), %v357_v10  ;;  %360 = vst [vmem:[#allocation2 + $0x58] sm:$0xff] (!%p301_p10), %v359_v11  ;;  %v363_v13 = vld [vmem:[%s2619_s4 + $0x68] sm:$0xff] (!%p301_p10)  ;;  %v365_v14 = vld [vmem:[%s2619_s4 + $0x70] sm:$0xff] (!%p301_p10) }
  0x52   : > { %362 = vst [vmem:[#allocation2 + $0x60] sm:$0xff] (!%p301_p10), %v361_v12  ;;  %364 = vst [vmem:[#allocation2 + $0x68] sm:$0xff] (!%p301_p10), %v363_v13  ;;  %v367_v15 = vld [vmem:[%s2619_s4 + $0x78] sm:$0xff] (!%p301_p10)  ;;  %v369_v16 = vld [vmem:[%s2619_s4 + $0x80] sm:$0xff] (!%p301_p10) }
  0x53   : > { %366 = vst [vmem:[#allocation2 + $0x70] sm:$0xff] %v365_v14  ;;  %v371_v17 = vld [vmem:[%s2619_s4 + $0x88] sm:$0xff]  ;;  %368 = vst [vmem:[#allocation2 + $0x78] sm:$0xff] %v367_v15  ;;  %v373_v18 = vld [vmem:[%s2619_s4 + $0x90] sm:$0xff] }
  0x54   : > { %370 = vst [vmem:[#allocation2 + $0x80] sm:$0xff] %v369_v16  ;;  %372 = vst [vmem:[#allocation2 + $0x88] sm:$0xff] %v371_v17  ;;  %v375_v19 = vld [vmem:[%s2619_s4 + $0x98] sm:$0xff]  ;;  %v377_v20 = vld [vmem:[%s2619_s4 + $0xa0] sm:$0xff] }
  0x55   : > { %374 = vst [vmem:[#allocation2 + $0x90] sm:$0xff] %v373_v18  ;;  %376 = vst [vmem:[#allocation2 + $0x98] sm:$0xff] %v375_v19  ;;  %v379_v21 = vld [vmem:[%s2619_s4 + $0xa8] sm:$0xff]  ;;  %v381_v22 = vld [vmem:[%s2619_s4 + $0xb0] sm:$0xff] }
  0x56   : > { %378 = vst [vmem:[#allocation2 + $0xa0] sm:$0xff] %v377_v20  ;;  %v383_v23 = vld [vmem:[%s2619_s4 + $0xb8] sm:$0xff]  ;;  %380 = vst [vmem:[#allocation2 + $0xa8] sm:$0xff] %v379_v21  ;;  %v385_v24 = vld [vmem:[%s2619_s4 + $0xc0] sm:$0xff] }
  0x57   : > { %382 = vst [vmem:[#allocation2 + $0xb0] sm:$0xff] %v381_v22  ;;  %384 = vst [vmem:[#allocation2 + $0xb8] sm:$0xff] %v383_v23  ;;  %v387_v25 = vld [vmem:[%s2619_s4 + $0xc8] sm:$0xff]  ;;  %v389_v26 = vld [vmem:[%s2619_s4 + $0xd0] sm:$0xff] }
  0x58   : > { %386 = vst [vmem:[#allocation2 + $0xc0] sm:$0xff] %v385_v24  ;;  %388 = vst [vmem:[#allocation2 + $0xc8] sm:$0xff] %v387_v25  ;;  %v391_v27 = vld [vmem:[%s2619_s4 + $0xd8] sm:$0xff]  ;;  %v393_v28 = vld [vmem:[%s2619_s4 + $0xe0] sm:$0xff] }
  0x59   : > { %390 = vst [vmem:[#allocation2 + $0xd0] sm:$0xff] %v389_v26  ;;  %v395_v29 = vld [vmem:[%s2619_s4 + $0xe8] sm:$0xff]  ;;  %392 = vst [vmem:[#allocation2 + $0xd8] sm:$0xff] %v391_v27  ;;  %v397_v30 = vld [vmem:[%s2619_s4 + $0xf0] sm:$0xff] }
  0x5a   : > { %394 = vst [vmem:[#allocation2 + $0xe0] sm:$0xff] %v393_v28  ;;  %396 = vst [vmem:[#allocation2 + $0xe8] sm:$0xff] %v395_v29  ;;  %v399_v31 = vld [vmem:[%s2619_s4 + $0xf8] sm:$0xff] }
  0x5b   : > { %398 = vst [vmem:[#allocation2 + $0xf0] sm:$0xff] %v397_v30  ;;  %400 = vst [vmem:[#allocation2 + $0xf8] sm:$0xff] %v399_v31 }
  0x5c   : > { %408 = vsyncadd [#allocation4], 4096 }
  0x5d   : > { %1774 = dma.done.wait [#allocation4], 4096 }
  0x5e   : > { %1775 = vsyncadd [#allocation4], 4294963200 }
  0x5f PF: > { %p1429_p8 = scmp.ne.s32.totalorder %s1794_s21, 0 }
  0x60   : > { %v415_v32 = vld [vmem:[#allocation2] sm:$0xff] (!%p1429_p8)  ;;  %v416_v33 = vld [vmem:[#allocation2 + $0x8] sm:$0xff] (!%p1429_p8)  ;;  %v417_v34 = vld [vmem:[#allocation2 + $0x10] sm:$0xff] (!%p1429_p8) }
  0x61   : > { %414 = sbr.rel (%p1429_p8) target bundleno = 111 (0x6f), region = 82  ;;  %v447_v35 = vpack.c.bf16 (!%p1429_p8), %v416_v33, %v415_v32  ;;  %v418_v36 = vld [vmem:[#allocation2 + $0x18] sm:$0xff] (!%p1429_p8)  ;;  %v419_v37 = vld [vmem:[#allocation2 + $0x20] sm:$0xff] (!%p1429_p8)  ;;  %v420_v38 = vld [vmem:[#allocation2 + $0x28] sm:$0xff] (!%p1429_p8) }
  0x62   : > { %v448_v39 = vpack.c.bf16 (!%p1429_p8), %v418_v36, %v417_v34  ;;  %v449_v40 = vpack.c.bf16 (!%p1429_p8), %v420_v38, %v419_v37  ;;  %v421_v41 = vld [vmem:[#allocation2 + $0x30] sm:$0xff] (!%p1429_p8)  ;;  %v422_v42 = vld [vmem:[#allocation2 + $0x38] sm:$0xff] (!%p1429_p8)  ;;  %v431_v55 = vld [vmem:[#allocation2 + $0x80] sm:$0xff] (!%p1429_p8) }
  0x63   : > { %v423_v43 = vld [vmem:[#allocation2 + $0x40] sm:$0xff] (!%p1429_p8)  ;;  %463 = vst [vmem:[#allocation3] sm:$0xff] (!%p1429_p8), %v447_v35  ;;  %v450_v44 = vpack.c.bf16 (!%p1429_p8), %v422_v42, %v421_v41  ;;  %v424_v45 = vld [vmem:[#allocation2 + $0x48] sm:$0xff] (!%p1429_p8)  ;;  %v433_v59 = vld [vmem:[#allocation2 + $0x90] sm:$0xff] (!%p1429_p8) }
  0x64   : > { %v425_v46 = vld [vmem:[#allocation2 + $0x50] sm:$0xff] (!%p1429_p8)  ;;  %v426_v47 = vld [vmem:[#allocation2 + $0x58] sm:$0xff] (!%p1429_p8)  ;;  %464 = vst [vmem:[#allocation3 + $0x8] sm:$0xff] (!%p1429_p8), %v448_v39  ;;  %465 = vst [vmem:[#allocation3 + $0x10] sm:$0xff] (!%p1429_p8), %v449_v40  ;;  %v451_v48 = vpack.c.bf16 (!%p1429_p8), %v424_v45, %v423_v43 }
  0x65   : > { %v452_v49 = vpack.c.bf16 (!%p1429_p8), %v426_v47, %v425_v46  ;;  %v427_v50 = vld [vmem:[#allocation2 + $0x60] sm:$0xff] (!%p1429_p8)  ;;  %v428_v51 = vld [vmem:[#allocation2 + $0x68] sm:$0xff] (!%p1429_p8)  ;;  %466 = vst [vmem:[#allocation3 + $0x18] sm:$0xff] (!%p1429_p8), %v450_v44  ;;  %v434_v60 = vld [vmem:[#allocation2 + $0x98] sm:$0xff] (!%p1429_p8) }
  0x66   : > { %v429_v52 = vld [vmem:[#allocation2 + $0x70] sm:$0xff] (!%p1429_p8)  ;;  %v453_v53 = vpack.c.bf16 (!%p1429_p8), %v428_v51, %v427_v50  ;;  %v430_v54 = vld [vmem:[#allocation2 + $0x78] sm:$0xff] (!%p1429_p8)  ;;  %v432_v56 = vld [vmem:[#allocation2 + $0x88] sm:$0xff] (!%p1429_p8)  ;;  %467 = vst [vmem:[#allocation3 + $0x20] sm:$0xff] (!%p1429_p8), %v451_v48  ;;  %v456_v62 = vpack.c.bf16 (!%p1429_p8), %v434_v60, %v433_v59 }
  0x67   : > { %468 = vst [vmem:[#allocation3 + $0x28] sm:$0xff] (!%p1429_p8), %v452_v49  ;;  %v454_v57 = vpack.c.bf16 (!%p1429_p8), %v430_v54, %v429_v52  ;;  %v455_v58 = vpack.c.bf16 (!%p1429_p8), %v432_v56, %v431_v55  ;;  %v435_v61 = vld [vmem:[#allocation2 + $0xa0] sm:$0xff] (!%p1429_p8)  ;;  %v436_v63 = vld [vmem:[#allocation2 + $0xa8] sm:$0xff] (!%p1429_p8)  ;;  %v437_v0 = vld [vmem:[#allocation2 + $0xb0] sm:$0xff] (!%p1429_p8) }
  0x68   : > { %469 = vst [vmem:[#allocation3 + $0x30] sm:$0xff] %v453_v53  ;;  %v438_v1 = vld [vmem:[#allocation2 + $0xb8] sm:$0xff]  ;;  %v457_v2 = vpack.c.bf16 %v436_v63, %v435_v61  ;;  %v439_v4 = vld [vmem:[#allocation2 + $0xc0] sm:$0xff]  ;;  %v440_v5 = vld [vmem:[#allocation2 + $0xc8] sm:$0xff] }
  0x69   : > { %470 = vst [vmem:[#allocation3 + $0x38] sm:$0xff] %v454_v57  ;;  %471 = vst [vmem:[#allocation3 + $0x40] sm:$0xff] %v455_v58  ;;  %v458_v3 = vpack.c.bf16 %v438_v1, %v437_v0  ;;  %v441_v6 = vld [vmem:[#allocation2 + $0xd0] sm:$0xff]  ;;  %v459_v7 = vpack.c.bf16 %v440_v5, %v439_v4  ;;  %v442_v8 = vld [vmem:[#allocation2 + $0xd8] sm:$0xff] }
  0x6a   : > { %472 = vst [vmem:[#allocation3 + $0x48] sm:$0xff] %v456_v62  ;;  %v443_v9 = vld [vmem:[#allocation2 + $0xe0] sm:$0xff]  ;;  %v444_v10 = vld [vmem:[#allocation2 + $0xe8] sm:$0xff]  ;;  %473 = vst [vmem:[#allocation3 + $0x50] sm:$0xff] %v457_v2  ;;  %v460_v11 = vpack.c.bf16 %v442_v8, %v441_v6 }
  0x6b   : > { %474 = vst [vmem:[#allocation3 + $0x58] sm:$0xff] %v458_v3  ;;  %v461_v12 = vpack.c.bf16 %v444_v10, %v443_v9  ;;  %v445_v13 = vld [vmem:[#allocation2 + $0xf0] sm:$0xff]  ;;  %v446_v14 = vld [vmem:[#allocation2 + $0xf8] sm:$0xff]  ;;  %475 = vst [vmem:[#allocation3 + $0x60] sm:$0xff] %v459_v7 }
  0x6c   : > { %v462_v15 = vpack.c.bf16 %v446_v14, %v445_v13  ;;  %476 = vst [vmem:[#allocation3 + $0x68] sm:$0xff] %v460_v11 }
  0x6d   : > { %477 = vst [vmem:[#allocation3 + $0x70] sm:$0xff] %v461_v12 }
  0x6e   : > { %478 = vst [vmem:[#allocation3 + $0x78] sm:$0xff] %v462_v15 }
  0x6f PF: > { %v1035_v16 = vld [vmem:[%s2007_s29 + $0x8] sm:$0xff]  ;;  %v2110_v17 = vld [vmem:[%s2007_s29] sm:$0xff]  ;;  %v1037_v20 = vld [vmem:[%s2007_s29 + $0x18] sm:$0xff]  ;;  %v1815_v27 = vmov 0   ;;  %p1431_p12 = scmp.ne.s32.totalorder %s1798_s22, 2 }
  0x70   : > { %v511_v18 = vld [vmem:[#allocation3 + $0x40] sm:$0xff]  ;;  %1052 = vadd.xlane.f32.xlu0 %v1035_v16  ;;  %1050 = vadd.xlane.f32.xlu1 %v2110_v17  ;;  %v1036_v21 = vld [vmem:[%s2007_s29 + $0x10] sm:$0xff]  ;;  %v1039_v25 = vld [vmem:[%s2007_s29 + $0x28] sm:$0xff] }
  0x71   : > { %v503_v19 = vld [vmem:[#allocation3] sm:$0xff]  ;;  %1441 = vmatprep.subr.bf16.mxu0 %v511_v18  ;;  %1505 = vmatprep.subr.bf16.mxu1 %v511_v18  ;;  %v512_v22 = vld [vmem:[#allocation3 + $0x48] sm:$0xff]  ;;  %v513_v24 = vld [vmem:[#allocation3 + $0x50] sm:$0xff] }
  0x72   : > { %1442 = vmatpush3.bf16.msra.mxu0 %v503_v19  ;;  %1513 = vmatpush3.bf16.msra.mxu1 %v503_v19  ;;  %v504_v23 = vld [vmem:[#allocation3 + $0x8] sm:$0xff]  ;;  %v1038_v26 = vld [vmem:[%s2007_s29 + $0x20] sm:$0xff]  ;;  %v505_v28 = vld [vmem:[#allocation3 + $0x10] sm:$0xff] }
  0x73   : > { %1443 = vmatprep.subr.bf16.mxu0 %v512_v22  ;;  %1506 = vmatprep.subr.bf16.mxu1 %v512_v22  ;;  %v514_v29 = vld [vmem:[#allocation3 + $0x58] sm:$0xff]  ;;  %v1040_v31 = vld [vmem:[%s2007_s29 + $0x30] sm:$0xff]  ;;  %v2120_v32 = vld [vmem:[%s1984_s15 + $0x8] sm:$0xff] }
  0x74   : > { %1056 = vadd.xlane.f32.xlu0 %v1037_v20  ;;  %1054 = vadd.xlane.f32.xlu1 %v1036_v21  ;;  %v1041_v30 = vld [vmem:[%s2007_s29 + $0x38] sm:$0xff]  ;;  %v488_v33 = vunpack.c.l.s8.bf16 %v2120_v32  ;;  %v2124_v34 = vld [vmem:[%s1984_s15 + $0x28] sm:$0xff]  ;;  %v515_v37 = vld [vmem:[#allocation3 + $0x60] sm:$0xff]  ;;  %v490_v58 = vunpack.c.h.s8.bf16 %v2120_v32 }
  0x75   : > { %1604 = vset.pattern.permute.xlu1 %v1815_v27  ;;  %1605 = vset.pattern.permute.xlu0 %v1815_v27  ;;  %v506_v35 = vld [vmem:[#allocation3 + $0x18] sm:$0xff]  ;;  %v496_v36 = vunpack.c.l.s8.bf16 %v2124_v34  ;;  %v2128_v38 = vld [vmem:[%s2007_s29 + $0x48] sm:$0xff]  ;;  %v2131_v39 = vld [vmem:[%s2007_s29 + $0x40] sm:$0xff]  ;;  %v498_v59 = vunpack.c.h.s8.bf16 %v2124_v34 }
  0x76   : > { %1444 = vmatpush3.bf16.msra.mxu0 %v504_v23  ;;  %1514 = vmatpush3.bf16.msra.mxu1 %v504_v23  ;;  %v507_v40 = vld [vmem:[#allocation3 + $0x20] sm:$0xff]  ;;  %v516_v41 = vld [vmem:[#allocation3 + $0x68] sm:$0xff]  ;;  %v2136_v42 = vld [vmem:[%s2007_s29 + $0x58] sm:$0xff] }
  0x77   : > { %1445 = vmatprep.subr.bf16.mxu0 %v513_v24  ;;  %1507 = vmatprep.subr.bf16.mxu1 %v513_v24  ;;  %2639 = vst [vmem:[#allocation16_spill] sm:$0xff] %v2136_v42  ;;  %v2139_v43 = vld [vmem:[%s2007_s29 + $0x50] sm:$0xff]  ;;  %v508_v44 = vld [vmem:[#allocation3 + $0x28] sm:$0xff]  ;;  %v2145_v47 = vld [vmem:[%s2007_s29 + $0x60] sm:$0xff] }
  0x78   : > { %1060 = vadd.xlane.f32.xlu0 %v1039_v25  ;;  %1058 = vadd.xlane.f32.xlu1 %v1038_v26  ;;  %v517_v45 = vld [vmem:[#allocation3 + $0x70] sm:$0xff]  ;;  %v1047_v46 = vld [vmem:[%s2007_s29 + $0x68] sm:$0xff]  ;;  %2640 = vst [vmem:[#allocation17_spill] sm:$0xff] %v2145_v47  ;;  %v518_v49 = vld [vmem:[#allocation3 + $0x78] sm:$0xff] }
  0x79   : > { %551 = vmatprep.mubr.bf16.mxu0 %v488_v33  ;;  %583 = vmatprep.mubr.bf16.mxu1 %v496_v36  ;;  %v509_v48 = vld [vmem:[#allocation3 + $0x30] sm:$0xff]  ;;  %v1049_v50 = vld [vmem:[%s2007_s29 + $0x78] sm:$0xff]  ;;  %v479_v52 = vld [vmem:[%s1984_s15] sm:$0xff] }
  0x7a   : > { %1446 = vmatpush3.bf16.msra.mxu0 %v505_v28  ;;  %1515 = vmatpush3.bf16.msra.mxu1 %v505_v28  ;;  %v1048_v51 = vld [vmem:[%s2007_s29 + $0x70] sm:$0xff]  ;;  %v483_v53 = vld [vmem:[%s1984_s15 + $0x20] sm:$0xff]  ;;  %v510_v54 = vld [vmem:[#allocation3 + $0x38] sm:$0xff]  ;;  %v487_v55 = vunpack.c.l.s8.bf16 %v479_v52  ;;  %v489_v0 = vunpack.c.h.s8.bf16 %v479_v52 }
  0x7b   : > { %1447 = vmatprep.subr.bf16.mxu0 %v514_v29  ;;  %1508 = vmatprep.subr.bf16.mxu1 %v514_v29  ;;  %v495_v56 = vunpack.c.l.s8.bf16 %v483_v53  ;;  %v2153_v57 = vld [vmem:[%s1997_s14 + $0x10] sm:$0xff]  ;;  %v2159_v60 = vld [vmem:[%s1997_s14 + $0x18] sm:$0xff]  ;;  %v2162_v61 = vld [vmem:[%s1997_s14] sm:$0xff]  ;;  %v497_v1 = vunpack.c.h.s8.bf16 %v483_v53 }
  0x7c   : > { %1064 = vadd.xlane.f32.xlu0 %v1041_v30  ;;  %1062 = vadd.xlane.f32.xlu1 %v1040_v31  ;;  %1606 = vrcp.f32 %v2153_v57  ;;  %v482_v62 = vld [vmem:[%s1984_s15 + $0x18] sm:$0xff]  ;;  %v2169_v2 = vld [vmem:[%s1997_s14 + $0x28] sm:$0xff]  ;;  %v481_v8 = vld [vmem:[%s1984_s15 + $0x10] sm:$0xff] }
  0x7d   : > { %v486_v63 = vld [vmem:[%s1984_s15 + $0x38] sm:$0xff]  ;;  %1608 = vrcp.f32 %v2159_v60  ;;  %v492_v3 = vunpack.c.l.s8.bf16 %v482_v62  ;;  %v2172_v5 = vld [vmem:[%s1997_s14 + $0x8] sm:$0xff]  ;;  %v485_v9 = vld [vmem:[%s1984_s15 + $0x30] sm:$0xff]  ;;  %v491_v11 = vunpack.c.l.s8.bf16 %v481_v8  ;;  %v494_v18 = vunpack.c.h.s8.bf16 %v482_v62  ;;  %s1430_s15 = sshll.u32 %s1794_s21, 7 }
  0x7e   : > { %1448 = vmatpush3.bf16.msra.mxu0 %v506_v35  ;;  %1516 = vmatpush3.bf16.msra.mxu1 %v506_v35  ;;  %1610 = vrcp.f32 %v2162_v61  ;;  %v500_v4 = vunpack.c.l.s8.bf16 %v486_v63  ;;  %v2177_v6 = vld [vmem:[%s1997_s14 + $0x38] sm:$0xff]  ;;  %v2182_v10 = vld [vmem:[%s1997_s14 + $0x20] sm:$0xff]  ;;  %v499_v12 = vunpack.c.l.s8.bf16 %v485_v9  ;;  %v2187_v13 = vld [vmem:[%s1997_s14 + $0x48] sm:$0xff]  ;;  %v502_v19 = vunpack.c.h.s8.bf16 %v486_v63 }
  0x7f   : > { %1449 = vmatprep.subr.bf16.mxu0 %v515_v37  ;;  %1509 = vmatprep.subr.bf16.mxu1 %v515_v37  ;;  %1612 = vrcp.f32 %v2169_v2  ;;  %v2190_v15 = vld [vmem:[%s1997_s14 + $0x30] sm:$0xff]  ;;  %v2195_v20 = vld [vmem:[%s1997_s14 + $0x58] sm:$0xff]  ;;  %v2198_v22 = vld [vmem:[%s1997_s14 + $0x40] sm:$0xff]  ;;  %v493_v24 = vunpack.c.h.s8.bf16 %v481_v8  ;;  %v501_v25 = vunpack.c.h.s8.bf16 %v485_v9 }
  0x80   : > { %1068 = vadd.xlane.f32.xlu0 %v2128_v38  ;;  %1066 = vadd.xlane.f32.xlu1 %v2131_v39  ;;  %1614 = vrcp.f32 %v2172_v5  ;;  %v2203_v26 = vld [vmem:[%s1997_s14 + $0x68] sm:$0xff]  ;;  %v2206_v28 = vld [vmem:[%s1997_s14 + $0x50] sm:$0xff]  ;;  %v2211_v30 = vld [vmem:[%s1997_s14 + $0x78] sm:$0xff] }
  0x81   : > { %1616 = vrcp.f32 %v2177_v6  ;;  %v2214_v32 = vld [vmem:[%s1997_s14 + $0x60] sm:$0xff]  ;;  %v2219_v35 = vld [vmem:[%s1997_s14 + $0x70] sm:$0xff]  ;;  %v801_v52 = vld [vmem:[%s2002_s12 + $0x38] sm:$0xff]  ;;  %s2315_s14 = scalar_lea.vmem [#allocation2], %s1430_s15 }
  0x82   : > { %1450 = vmatpush3.bf16.msra.mxu0 %v507_v40  ;;  %1517 = vmatpush3.bf16.msra.mxu1 %v507_v40  ;;  %1618 = vrcp.f32 %v2182_v10  ;;  %v798_v53 = vld [vmem:[%s2002_s12 + $0x20] sm:$0xff]  ;;  %v804_v62 = vld [vmem:[%s2002_s12 + $0x50] sm:$0xff]  ;;  %v809_v63 = vld [vmem:[%s2002_s12 + $0x78] sm:$0xff] }
  0x83   : > { %1451 = vmatprep.subr.bf16.mxu0 %v516_v41  ;;  %1510 = vmatprep.subr.bf16.mxu1 %v516_v41  ;;  %1620 = vrcp.f32 %v2187_v13 }
  0x84   : > { %1072 = vadd.xlane.f32.xlu0 %v2136_v42  ;;  %1070 = vadd.xlane.f32.xlu1 %v2139_v43  ;;  %1622 = vrcp.f32 %v2190_v15 }
  0x85   : > { %1624 = vrcp.f32 %v2195_v20 }
  0x86   : > { %1452 = vmatpush3.bf16.msra.mxu0 %v508_v44  ;;  %1518 = vmatpush3.bf16.msra.mxu1 %v508_v44  ;;  %v1607_v7 = vpop.eup %1606  ;;  %1626 = vrcp.f32 %v2198_v22 }
  0x87   : > { %1453 = vmatprep.subr.bf16.mxu0 %v517_v45  ;;  %1511 = vmatprep.subr.bf16.mxu1 %v517_v45  ;;  %v1609_v14 = vpop.eup %1608  ;;  %1628 = vrcp.f32 %v2203_v26 }
  0x88   : > { %1076 = vadd.xlane.f32.xlu0 %v1047_v46  ;;  %1074 = vadd.xlane.f32.xlu1 %v2145_v47  ;;  %v1611_v16 = vpop.eup %1610  ;;  %1630 = vrcp.f32 %v2206_v28  ;;  %v795_v46 = vld [vmem:[%s2002_s12 + $0x8] sm:$0xff] }
  0x89   : > { %v1613_v21 = vpop.eup %1612  ;;  %1632 = vrcp.f32 %v2211_v30 }
  0x8a   : > { %1454 = vmatpush3.bf16.msra.mxu0 %v509_v48  ;;  %1519 = vmatpush3.bf16.msra.mxu1 %v509_v48  ;;  %v1615_v23 = vpop.eup %1614  ;;  %1634 = vrcp.f32 %v2214_v32  ;;  %v797_v48 = vld [vmem:[%s2002_s12 + $0x18] sm:$0xff] }
  0x8b   : > { %1455 = vmatprep.subr.bf16.mxu0 %v518_v49  ;;  %1512 = vmatprep.subr.bf16.mxu1 %v518_v49  ;;  %v1617_v27 = vpop.eup %1616  ;;  %1636 = vrcp.f32 %v2219_v35  ;;  %v794_v49 = vld [vmem:[%s2002_s12] sm:$0xff] }
  0x8c   : > { %1080 = vadd.xlane.f32.xlu0 %v1049_v50  ;;  %1078 = vadd.xlane.f32.xlu1 %v1048_v51  ;;  %v1619_v29 = vpop.eup %1618  ;;  %v799_v50 = vld [vmem:[%s2002_s12 + $0x28] sm:$0xff]  ;;  %v796_v51 = vld [vmem:[%s2002_s12 + $0x10] sm:$0xff] }
  0x8d   : > { %v1621_v31 = vpop.eup %1620 }
  0x8e   : > { %1456 = vmatpush3.bf16.msra.mxu0 %v510_v54  ;;  %1520 = vmatpush3.bf16.msra.mxu1 %v510_v54  ;;  %v1623_v33 = vpop.eup %1622  ;;  %v803_v54 = vld [vmem:[%s2002_s12 + $0x48] sm:$0xff] }
  0x8f   : > { %v1625_v34 = vpop.eup %1624 }
  0x90   : > { %v1627_v36 = vpop.eup %1626 }
  0x91   : > { %552 = vmatmul.mubr.bf16.vlgmr.msra.gmra.mrb[0].mxu0 %v487_v55  ;;  %584 = vmatmul.mubr.bf16.vlgmr.msra.gmra.mrb[0].mxu1 %v495_v56  ;;  %v1629_v37 = vpop.eup %1628  ;;  %v800_v55 = vld [vmem:[%s2002_s12 + $0x30] sm:$0xff]  ;;  %v805_v56 = vld [vmem:[%s2002_s12 + $0x58] sm:$0xff] }
  0x92   : > { %559 = vmatprep.mubr.bf16.mxu0 %v490_v58  ;;  %591 = vmatprep.mubr.bf16.mxu1 %v498_v59  ;;  %v1631_v40 = vpop.eup %1630  ;;  %v802_v58 = vld [vmem:[%s2002_s12 + $0x40] sm:$0xff]  ;;  %v807_v59 = vld [vmem:[%s2002_s12 + $0x68] sm:$0xff] }
  0x93   : > { %v1633_v41 = vpop.eup %1632 }
  0x94   : > { %v1635_v44 = vpop.eup %1634 }
  0x95   : > { %v1637_v45 = vpop.eup %1636 }
  0x99   : > { %560 = vmatmul.mubr.bf16.gmra.mrb[4].mxu0 %v489_v0  ;;  %592 = vmatmul.mubr.bf16.gmra.mrb[4].mxu1 %v497_v1  ;;  %v806_v0 = vld [vmem:[%s2002_s12 + $0x60] sm:$0xff]  ;;  %v808_v1 = vld [vmem:[%s2002_s12 + $0x70] sm:$0xff] }
  0x9a   : > { %567 = vmatprep.mubr.bf16.mxu0 %v492_v3  ;;  %599 = vmatprep.mubr.bf16.mxu1 %v500_v4 }
  0x9d   : > { %694 = vperm.xlu1 %1604, %v1607_v7  }
  0xa1   : > { %568 = vmatmul.mubr.bf16.gmra.mrb[8].mxu0 %v491_v11  ;;  %600 = vmatmul.mubr.bf16.gmra.mrb[8].mxu1 %v499_v12 }
  0xa2   : > { %699 = vperm.xlu1 %1604, %v1609_v14   ;;  %684 = vperm.xlu0 %1605, %v1611_v16  }
  0xa3   : > { %575 = vmatprep.mubr.bf16.mxu0 %v494_v18  ;;  %607 = vmatprep.mubr.bf16.mxu1 %v502_v19 }
  0xa6   : > { %709 = vperm.xlu1 %1604, %v1613_v21   ;;  %689 = vperm.xlu0 %1605, %v1615_v23  }
  0xa9   : > { %576 = vmatmul.mubr.bf16.gmra.mrb[12].mxu0 %v493_v24  ;;  %608 = vmatmul.mubr.bf16.gmra.mrb[12].mxu1 %v501_v25 }
  0xaa   : > { %719 = vperm.xlu1 %1604, %v1617_v27   ;;  %704 = vperm.xlu0 %1605, %v1619_v29  }
  0xae   : > { %729 = vperm.xlu1 %1604, %v1621_v31   ;;  %714 = vperm.xlu0 %1605, %v1623_v33  }
  0xb2   : > { %739 = vperm.xlu1 %1604, %v1625_v34   ;;  %724 = vperm.xlu0 %1605, %v1627_v36  }
  0xb6   : > { %749 = vperm.xlu1 %1604, %v1629_v37   ;;  %734 = vperm.xlu0 %1605, %v1631_v40  }
  0xba   : > { %759 = vperm.xlu1 %1604, %v1633_v41   ;;  %744 = vperm.xlu0 %1605, %v1635_v44  }
  0xbe   : > { %817 = vperm.xlu1 %1604, %v795_v46   ;;  %754 = vperm.xlu0 %1605, %v1637_v45   ;;  %v634_v45 = vld [vmem:[%s2315_s14] sm:$0xff] }
  0xbf   : > { %v642_v46 = vld [vmem:[%s2315_s14 + $0x40] sm:$0xff] }
  0xc2   : > { %827 = vperm.xlu1 %1604, %v797_v48   ;;  %812 = vperm.xlu0 %1605, %v794_v49   ;;  %v635_v48 = vld [vmem:[%s2315_s14 + $0x8] sm:$0xff] }
  0xc6   : > { %837 = vperm.xlu1 %1604, %v799_v50   ;;  %822 = vperm.xlu0 %1605, %v796_v51  }
  0xca   : > { %847 = vperm.xlu1 %1604, %v801_v52   ;;  %832 = vperm.xlu0 %1605, %v798_v53   ;;  %v643_v52 = vld [vmem:[%s2315_s14 + $0x48] sm:$0xff] }
  0xce   : > { %857 = vperm.xlu1 %1604, %v803_v54   ;;  %842 = vperm.xlu0 %1605, %v800_v55  }
  0xd2   : > { %867 = vperm.xlu1 %1604, %v805_v56   ;;  %852 = vperm.xlu0 %1605, %v802_v58  }
  0xd6   : > { %877 = vperm.xlu1 %1604, %v807_v59   ;;  %862 = vperm.xlu0 %1605, %v804_v62  }
  0xda   : > { %887 = vperm.xlu1 %1604, %v809_v63   ;;  %872 = vperm.xlu0 %1605, %v806_v0   ;;  %v636_v0 = vld [vmem:[%s2315_s14 + $0x10] sm:$0xff] }
  0xde   : > { %1132 = vperm.xlu1 %1604, %v2162_v61   ;;  %882 = vperm.xlu0 %1605, %v808_v1  }
  0xe2   : > { %1142 = vperm.xlu1 %1604, %v2153_v57   ;;  %1137 = vperm.xlu0 %1605, %v2172_v5  }
  0xe6   : > { %1147 = vperm.xlu1 %1604, %v2159_v60   ;;  %1152 = vperm.xlu0 %1605, %v2182_v10  }
  0xea   : > { %1157 = vperm.xlu1 %1604, %v2169_v2   ;;  %1162 = vperm.xlu0 %1605, %v2190_v15  }
  0xee   : > { %1167 = vperm.xlu1 %1604, %v2177_v6   ;;  %1172 = vperm.xlu0 %1605, %v2198_v22  }
  0xf2   : > { %1177 = vperm.xlu1 %1604, %v2187_v13   ;;  %1182 = vperm.xlu0 %1605, %v2206_v28  }
  0xf6   : > { %1187 = vperm.xlu1 %1604, %v2195_v20   ;;  %1192 = vperm.xlu0 %1605, %v2214_v32  }
  0xfa   : > { %1197 = vperm.xlu1 %1604, %v2203_v26  }
  0xfd   : > { %v2252_v57 = vpop.xlane.xlu1 %1050  ;;  %v2254_v60 = vpop.xlane.xlu0 %1052 }
 0x101   : > { %v2256_v61 = vpop.xlane.xlu1 %1054  ;;  %v2258_v2 = vpop.xlane.xlu0 %1056 }
 0x105   : > { %v2260_v3 = vpop.xlane.xlu1 %1058  ;;  %v2262_v4 = vpop.xlane.xlu0 %1060 }
 0x106   : > { %2641 = vst [vmem:[#allocation18_spill] sm:$0xff] %v2262_v4 }
 0x109   : > { %v2264_v5 = vpop.xlane.xlu1 %1062  ;;  %v2266_v6 = vpop.xlane.xlu0 %1064 }
 0x10a   : > { %2642 = vst [vmem:[#allocation19_spill] sm:$0xff] %v2264_v5  ;;  %2643 = vst [vmem:[#allocation20_spill] sm:$0xff] %v2266_v6 }
 0x10d   : > { %v2268_v7 = vpop.xlane.xlu1 %1066  ;;  %v2270_v8 = vpop.xlane.xlu0 %1068 }
 0x111   : > { %v2272_v9 = vpop.xlane.xlu1 %1070  ;;  %v2274_v10 = vpop.xlane.xlu0 %1072 }
 0x112   : > { %2644 = vst [vmem:[#allocation21_spill] sm:$0xff] %v2274_v10 }
 0x115   : > { %v2276_v11 = vpop.xlane.xlu1 %1074  ;;  %v2278_v12 = vpop.xlane.xlu0 %1076 }
 0x116   : > { %2645 = vst [vmem:[#allocation22_spill] sm:$0xff] %v2276_v11  ;;  %2646 = vst [vmem:[#allocation23_spill] sm:$0xff] %v2278_v12 }
 0x119   : > { %v2280_v13 = vpop.xlane.xlu1 %1078  ;;  %v2282_v14 = vpop.xlane.xlu0 %1080 }
 0x11a   : > { %2647 = vst [vmem:[#allocation24_spill] sm:$0xff] %v2280_v13  ;;  %2648 = vst [vmem:[#allocation25_spill] sm:$0xff] %v2282_v14  ;;  %v644_v14 = vld [vmem:[%s2315_s14 + $0x50] sm:$0xff] }
 0x11d   : > { %v695_v15 = vpop.permute.xlu1 %694 }
 0x11e   : > { %v764_v4 = vmul.f32 %v695_v15, %v636_v0 }
 0x121   : > { %v685_v16 = vpop.permute.xlu0 %684  ;;  %v2284_v19 = vpop.permute.xlu1 %699 }
 0x122   : > { %v762_v51 = vmul.f32 %v685_v16, %v634_v45 }
 0x124   : > { %v778_v12 = vmul.f32 0.1, %v762_v51 }
 0x125   : > { %v690_v18 = vpop.permute.xlu0 %689  ;;  %v2288_v21 = vpop.permute.xlu1 %709 }
 0x126   : > { %v763_v59 = vmul.f32 %v690_v18, %v635_v48 }
 0x128   : > { %v779_v11 = vmul.f32 0.1, %v763_v59 }
 0x129   : > { %v2286_v20 = vpop.permute.xlu0 %704  ;;  %v2292_v23 = vpop.permute.xlu1 %719 }
 0x12d   : > { %v2290_v22 = vpop.permute.xlu0 %714  ;;  %v730_v25 = vpop.permute.xlu1 %729 }
 0x12e   : > { %v771_v1 = vmul.f32 %v730_v25, %v643_v52  ;;  %v637_v25 = vld [vmem:[%s2315_s14 + $0x18] sm:$0xff] }
 0x130   : > { %v787_v52 = vmul.f32 0.1, %v771_v1 }
 0x131   : > { %v725_v24 = vpop.permute.xlu0 %724  ;;  %v2294_v27 = vpop.permute.xlu1 %739 }
 0x132   : > { %v770_v53 = vmul.f32 %v725_v24, %v642_v46 }
 0x134   : > { %v786_v47 = vmul.f32 0.1, %v770_v53 }
 0x135   : > { %v735_v26 = vpop.permute.xlu0 %734  ;;  %v2298_v29 = vpop.permute.xlu1 %749 }
 0x139   : > { %v2296_v28 = vpop.permute.xlu0 %744  ;;  %v2302_v32 = vpop.permute.xlu1 %759 }
 0x13d   : > { %v2300_v31 = vpop.permute.xlu0 %754  ;;  %v818_v34 = vpop.permute.xlu1 %817 }
 0x141   : > { %v813_v33 = vpop.permute.xlu0 %812  ;;  %v2306_v37 = vpop.permute.xlu1 %827 }
 0x145   : > { %v2304_v36 = vpop.permute.xlu0 %822  ;;  %v2311_v41 = vpop.permute.xlu1 %837 }
 0x149   : > { %v2308_v40 = vpop.permute.xlu0 %832  ;;  %v2320_v49 = vpop.permute.xlu1 %847 }
 0x14d   : > { %v2313_v44 = vpop.permute.xlu0 %842  ;;  %v858_v10 = vpop.permute.xlu1 %857 }
 0x151   : > { %v853_v50 = vpop.permute.xlu0 %852 }
 0x155   : > { %v863_v51 = vpop.permute.xlu0 %862 }
 0x164   : > { %v1457_v54 = vpop.f32.mrb[0].mxu0  ;;  %v1481_v55 = vpop.f32.mrb[0].mxu1 }
 0x165   : > { %v1458_v56 = vpop.f32.mrb[1].mxu0  ;;  %v1482_v58 = vpop.f32.mrb[1].mxu1 }
 0x166   : > { %v1459_v62 = vadd.f32 %v1458_v56, %v1457_v54  ;;  %v1483_v63 = vadd.f32 %v1482_v58, %v1481_v55  ;;  %v1460_v6 = vpop.f32.mrb[2].mxu0  ;;  %v1484_v13 = vpop.f32.mrb[2].mxu1  ;;  %v772_v54 = vmul.f32 %v735_v26, %v644_v14  ;;  %v765_v14 = vmul.f32 %v2284_v19, %v637_v25 }
 0x167   : > { %v1461_v16 = vpop.f32.mrb[3].mxu0  ;;  %v1485_v45 = vpop.f32.mrb[3].mxu1 }
 0x168   : > { %v890_v5 = vmul.f32 %v1459_v62, %v813_v33  ;;  %v898_v42 = vmul.f32 %v1483_v63, %v853_v50  ;;  %v1462_v24 = vadd.f32 %v1461_v16, %v1460_v6  ;;  %v1486_v46 = vadd.f32 %v1485_v45, %v1484_v13 }
 0x169   : > { %v788_v26 = vmul.f32 0.1, %v772_v54  ;;  %v781_v54 = vmul.f32 0.1, %v765_v14 }
 0x16a   : > { %v2325_v18 = vadd.f32 %v898_v42, %v786_v47  ;;  %v2327_v48 = vadd.f32 %v890_v5, %v778_v12  ;;  %v891_v53 = vmul.f32 %v1462_v24, %v818_v34  ;;  %v899_v33 = vmul.f32 %v1486_v46, %v858_v10  ;;  %v638_v5 = vld [vmem:[%s2315_s14 + $0x20] sm:$0xff]  ;;  %v645_v12 = vld [vmem:[%s2315_s14 + $0x58] sm:$0xff] }
 0x16b   : > { %v780_v10 = vmul.f32 0.1, %v764_v4  ;;  %v646_v4 = vld [vmem:[%s2315_s14 + $0x60] sm:$0xff] }
 0x16c   : > { %v1463_v50 = vpop.f32.mrb[4].mxu0  ;;  %v1487_v55 = vpop.f32.mrb[4].mxu1  ;;  %v930_v6 = vand.u32 2147483647, %v2325_v18  ;;  %v922_v13 = vand.u32 2147483647, %v2327_v48  ;;  %v2332_v42 = vadd.f32 %v891_v53, %v779_v11  ;;  %v2334_v47 = vadd.f32 %v899_v33, %v787_v52 }
 0x16d   : > { %v1464_v15 = vpop.f32.mrb[5].mxu0  ;;  %v1488_v56 = vpop.f32.mrb[5].mxu1  ;;  %v773_v52 = vmul.f32 %v2294_v27, %v645_v12 }
 0x16e   : > { %v1465_v58 = vadd.f32 %v1464_v15, %v1463_v50  ;;  %v1489_v59 = vadd.f32 %v1488_v56, %v1487_v55  ;;  %954 = vadd.xlane.f32.xlu1 %v930_v6  ;;  %938 = vadd.xlane.f32.xlu0 %v922_v13  ;;  %v1490_v34 = vpop.f32.mrb[6].mxu1  ;;  %v1466_v62 = vpop.f32.mrb[6].mxu0  ;;  %v923_v16 = vand.u32 2147483647, %v2332_v42  ;;  %v931_v45 = vand.u32 2147483647, %v2334_v47 }
 0x16f   : > { %v1467_v0 = vpop.f32.mrb[7].mxu0  ;;  %v1491_v1 = vpop.f32.mrb[7].mxu1  ;;  %v774_v56 = vmul.f32 %v2296_v28, %v646_v4 }
 0x170   : > { %v892_v63 = vmul.f32 %v1465_v58, %v2304_v36  ;;  %v900_v11 = vmul.f32 %v1489_v59, %v863_v51  ;;  %v1468_v24 = vadd.f32 %v1467_v0, %v1466_v62  ;;  %v1492_v46 = vadd.f32 %v1491_v1, %v1490_v34  ;;  %v639_v36 = vld [vmem:[%s2315_s14 + $0x28] sm:$0xff]  ;;  %v868_v53 = vpop.permute.xlu1 %867  ;;  %v873_v33 = vpop.permute.xlu0 %872  ;;  %v640_v34 = vld [vmem:[%s2315_s14 + $0x30] sm:$0xff] }
 0x171   : > { %v766_v51 = vmul.f32 %v2286_v20, %v638_v5  ;;  %v647_v20 = vld [vmem:[%s2315_s14 + $0x68] sm:$0xff] }
 0x172   : > { %940 = vadd.xlane.f32.xlu1 %v923_v16  ;;  %956 = vadd.xlane.f32.xlu0 %v931_v45  ;;  %v2344_v19 = vadd.f32 %v900_v11, %v788_v26  ;;  %v2346_v25 = vadd.f32 %v892_v63, %v780_v10  ;;  %v893_v50 = vmul.f32 %v1468_v24, %v2306_v37  ;;  %v789_v10 = vmul.f32 0.1, %v773_v52 }
 0x173   : > { %v901_v55 = vmul.f32 %v1492_v46, %v868_v53  ;;  %v767_v37 = vmul.f32 %v2288_v21, %v639_v36  ;;  %v782_v26 = vmul.f32 0.1, %v766_v51  ;;  %v775_v24 = vmul.f32 %v2298_v29, %v647_v20  ;;  %v641_v21 = vld [vmem:[%s2315_s14 + $0x38] sm:$0xff]  ;;  %v648_v53 = vld [vmem:[%s2315_s14 + $0x70] sm:$0xff] }
 0x174   : > { %v1469_v6 = vpop.f32.mrb[8].mxu0  ;;  %v1493_v27 = vpop.f32.mrb[8].mxu1  ;;  %v932_v13 = vand.u32 2147483647, %v2344_v19  ;;  %v924_v15 = vand.u32 2147483647, %v2346_v25  ;;  %v2354_v59 = vadd.f32 %v893_v50, %v781_v54  ;;  %v768_v54 = vmul.f32 %v2290_v22, %v640_v34 }
 0x175   : > { %v1470_v12 = vpop.f32.mrb[9].mxu0  ;;  %v1494_v58 = vpop.f32.mrb[9].mxu1  ;;  %v2361_v45 = vadd.f32 %v901_v55, %v789_v10  ;;  %v790_v46 = vmul.f32 0.1, %v774_v56  ;;  %v769_v22 = vmul.f32 %v2292_v23, %v641_v21  ;;  %v791_v56 = vmul.f32 0.1, %v775_v24 }
 0x176   : > { %v1471_v5 = vadd.f32 %v1470_v12, %v1469_v6  ;;  %v1495_v14 = vadd.f32 %v1494_v58, %v1493_v27  ;;  %958 = vadd.xlane.f32.xlu1 %v932_v13  ;;  %942 = vadd.xlane.f32.xlu0 %v924_v15  ;;  %v1472_v62 = vpop.f32.mrb[10].mxu0  ;;  %v1496_v63 = vpop.f32.mrb[10].mxu1  ;;  %v925_v16 = vand.u32 2147483647, %v2354_v59  ;;  %v784_v20 = vmul.f32 0.1, %v768_v54 }
 0x177   : > { %v1473_v0 = vpop.f32.mrb[11].mxu0  ;;  %v1497_v1 = vpop.f32.mrb[11].mxu1  ;;  %v933_v15 = vand.u32 2147483647, %v2361_v45 }
 0x178   : > { %v894_v11 = vmul.f32 %v1471_v5, %v2308_v40  ;;  %v902_v28 = vmul.f32 %v1495_v14, %v873_v33  ;;  %v1474_v52 = vadd.f32 %v1473_v0, %v1472_v62  ;;  %v1498_v4 = vadd.f32 %v1497_v1, %v1496_v63  ;;  %v878_v36 = vpop.permute.xlu1 %877  ;;  %v883_v33 = vpop.permute.xlu0 %882  ;;  %v649_v5 = vld [vmem:[%s2315_s14 + $0x78] sm:$0xff] }
 0x179   : > { %v783_v40 = vmul.f32 0.1, %v767_v37 }
 0x17a   : > { %944 = vadd.xlane.f32.xlu0 %v925_v16  ;;  %v2366_v51 = vadd.f32 %v894_v11, %v782_v26  ;;  %v895_v50 = vmul.f32 %v1474_v52, %v2311_v41  ;;  %v903_v55 = vmul.f32 %v1498_v4, %v878_v36  ;;  %v2370_v6 = vadd.f32 %v902_v28, %v790_v46 }
 0x17b   : > { %v776_v41 = vmul.f32 %v2300_v31, %v648_v53  ;;  %v785_v31 = vmul.f32 0.1, %v769_v22  ;;  %v777_v46 = vmul.f32 %v2302_v32, %v649_v5 }
 0x17c   : > { %v1475_v29 = vpop.f32.mrb[12].mxu0  ;;  %v1499_v27 = vpop.f32.mrb[12].mxu1  ;;  %v926_v13 = vand.u32 2147483647, %v2366_v51  ;;  %v2375_v10 = vadd.f32 %v895_v50, %v783_v40  ;;  %v934_v11 = vand.u32 2147483647, %v2370_v6  ;;  %v2381_v28 = vadd.f32 %v903_v55, %v791_v56 }
 0x17d   : > { %v1476_v12 = vpop.f32.mrb[13].mxu0  ;;  %v1500_v58 = vpop.f32.mrb[13].mxu1  ;;  %v792_v52 = vmul.f32 0.1, %v776_v41  ;;  %v793_v50 = vmul.f32 0.1, %v777_v46 }
 0x17e   : > { %v1477_v14 = vadd.f32 %v1476_v12, %v1475_v29  ;;  %v1501_v37 = vadd.f32 %v1500_v58, %v1499_v27  ;;  %v1478_v26 = vpop.f32.mrb[14].mxu0  ;;  %v1502_v34 = vpop.f32.mrb[14].mxu1  ;;  %946 = vadd.xlane.f32.xlu1 %v926_v13  ;;  %960 = vadd.xlane.f32.xlu0 %v933_v15  ;;  %v927_v23 = vand.u32 2147483647, %v2375_v10  ;;  %v935_v36 = vand.u32 2147483647, %v2381_v28 }
 0x17f   : > { %v1479_v62 = vpop.f32.mrb[15].mxu0  ;;  %v1503_v63 = vpop.f32.mrb[15].mxu1 }
 0x180   : > { %v896_v0 = vmul.f32 %v1477_v14, %v2313_v44  ;;  %v904_v1 = vmul.f32 %v1501_v37, %v883_v33  ;;  %v1480_v16 = vadd.f32 %v1479_v62, %v1478_v26  ;;  %v1504_v24 = vadd.f32 %v1503_v63, %v1502_v34  ;;  %v888_v54 = vpop.permute.xlu1 %887  ;;  %v2403_v15 = vpop.permute.xlu0 %1137 }
 0x182   : > { %v897_v4 = vmul.f32 %v1480_v16, %v2320_v49  ;;  %962 = vadd.xlane.f32.xlu1 %v934_v11  ;;  %948 = vadd.xlane.f32.xlu0 %v927_v23  ;;  %v2386_v21 = vadd.f32 %v896_v0, %v784_v20  ;;  %v905_v40 = vmul.f32 %v1504_v24, %v888_v54 }
 0x183   : > { %v2390_v44 = vadd.f32 %v904_v1, %v792_v52 }
 0x184   : > { %v928_v53 = vand.u32 2147483647, %v2386_v21  ;;  %v2392_v33 = vadd.f32 %v897_v4, %v785_v31  ;;  %v2396_v55 = vadd.f32 %v905_v40, %v793_v50  ;;  %v1133_v27 = vpop.permute.xlu1 %1132  ;;  %v2407_v56 = vpop.permute.xlu0 %1152  ;;  %v1090_v40 = vsub.f32 1.0, %v2268_v7 }
 0x185   : > { %v936_v32 = vand.u32 2147483647, %v2390_v44  ;;  %v1082_v50 = vsub.f32 1.0, %v2252_v57  ;;  %v1091_v57 = vsub.f32 1.0, %v2270_v8 }
 0x186   : > { %950 = vadd.xlane.f32.xlu1 %v928_v53  ;;  %964 = vadd.xlane.f32.xlu0 %v935_v36  ;;  %v929_v49 = vand.u32 2147483647, %v2392_v33  ;;  %v937_v29 = vand.u32 2147483647, %v2396_v55 }
 0x188   : > { %v2401_v13 = vpop.permute.xlu1 %1142  ;;  %v2411_v58 = vpop.permute.xlu0 %1162 }
 0x18a   : > { %966 = vadd.xlane.f32.xlu1 %v936_v32  ;;  %952 = vadd.xlane.f32.xlu0 %v929_v49 }
 0x18c   : > { %v2405_v22 = vpop.permute.xlu1 %1147  ;;  %v1173_v5 = vpop.permute.xlu0 %1172 }
 0x18e   : > { %968 = vadd.xlane.f32.xlu0 %v937_v29 }
 0x190   : > { %v2409_v12 = vpop.permute.xlu1 %1157 }
 0x194   : > { %v2413_v20 = vpop.permute.xlu1 %1167 }
 0x198   : > { %v2415_v41 = vpop.permute.xlu1 %1177 }
 0x19b   : > { %1207 = vperm.xlu1 %1604, %v2211_v30   ;;  %v2417_v30 = vpop.permute.xlu0 %1182 }
 0x19f   : > { %v2421_v14 = vpop.permute.xlu0 %1192 }
 0x1a4   : > { %1202 = vperm.xlu0 %1605, %v2219_v35   ;;  %v2419_v35 = vpop.permute.xlu1 %1187 }
 0x1a8   : > { %v2423_v37 = vpop.permute.xlu1 %1197 }
 0x1fb   : > { %v955_v26 = vpop.xlane.xlu1 %954  ;;  %v939_v34 = vpop.xlane.xlu0 %938 }
 0x1fc   : > { %v978_v62 = vmax.f32 %v955_v26, 1e-12  ;;  %v970_v63 = vmax.f32 %v939_v34, 1e-12 }
 0x1fe   : > { %1638 = vrcp.f32 %v978_v62 }
 0x1ff   : > { %1640 = vrcp.f32 %v970_v63  ;;  %v941_v11 = vpop.xlane.xlu1 %940  ;;  %v957_v23 = vpop.xlane.xlu0 %956 }
 0x200   : > { %v971_v0 = vmax.f32 %v941_v11, 1e-12  ;;  %v979_v1 = vmax.f32 %v957_v23, 1e-12 }
 0x202   : > { %1642 = vrcp.f32 %v971_v0  ;;  %v1083_v0 = vsub.f32 1.0, %v2254_v60 }
 0x203   : > { %1644 = vrcp.f32 %v979_v1  ;;  %v959_v16 = vpop.xlane.xlu1 %958  ;;  %v943_v24 = vpop.xlane.xlu0 %942 }
 0x204   : > { %v980_v31 = vmax.f32 %v959_v16, 1e-12  ;;  %v972_v46 = vmax.f32 %v943_v24, 1e-12 }
 0x206   : > { %1646 = vrcp.f32 %v980_v31 }
 0x207   : > { %1648 = vrcp.f32 %v972_v46  ;;  %v945_v52 = vpop.xlane.xlu0 %944 }
 0x208   : > { %v1639_v4 = vpop.eup %1638  ;;  %v973_v54 = vmax.f32 %v945_v52, 1e-12 }
 0x209   : > { %v1641_v36 = vpop.eup %1640  ;;  %v1026_v53 = vmul.f32 %v1639_v4, %v2325_v18 }
 0x20a   : > { %v1018_v32 = vmul.f32 %v1641_v36, %v2327_v48  ;;  %1650 = vrcp.f32 %v973_v54  ;;  %v1670_v54 = vld [vmem:[%s2007_s29 + $0x8] sm:$0xff]  ;;  %v1084_v36 = vsub.f32 1.0, %v2256_v61 }
 0x20b   : > { %v1106_v49 = vmul.f32 %v1090_v40, %v1026_v53  ;;  %v947_v29 = vpop.xlane.xlu1 %946  ;;  %v961_v26 = vpop.xlane.xlu0 %960 }
 0x20c   : > { %v1643_v34 = vpop.eup %1642  ;;  %v1098_v62 = vmul.f32 %v1082_v50, %v1018_v32  ;;  %v974_v63 = vmax.f32 %v947_v29, 1e-12  ;;  %v981_v11 = vmax.f32 %v961_v26, 1e-12  ;;  %v1085_v26 = vsub.f32 1.0, %v2258_v2 }
 0x20d   : > { %v1645_v23 = vpop.eup %1644  ;;  %v2431_v1 = vadd.f32 %v1106_v49, %v2131_v39  ;;  %v1019_v7 = vmul.f32 %v1643_v34, %v2332_v42 }
 0x20e   : > { %v2436_v18 = vadd.f32 %v1098_v62, %v2110_v17  ;;  %v1027_v48 = vmul.f32 %v1645_v23, %v2334_v47  ;;  %1652 = vrcp.f32 %v974_v63  ;;  %v1092_v17 = vsub.f32 1.0, %v2272_v9 }
 0x20f   : > { %v1218_v16 = vmul.f32 %v1173_v5, %v2431_v1  ;;  %v1099_v24 = vmul.f32 %v1083_v0, %v1019_v7  ;;  %1654 = vrcp.f32 %v981_v11  ;;  %v963_v60 = vpop.xlane.xlu1 %962  ;;  %v949_v39 = vpop.xlane.xlu0 %948  ;;  %1254 = vst [vmem:[%s2009_s28 + $0x40] sm:$0xff] (!%p1431_p12), %v2431_v1 }
 0x210   : > { %v1647_v31 = vpop.eup %1646  ;;  %v1210_v42 = vmul.f32 %v1133_v27, %v2436_v18  ;;  %v1107_v46 = vmul.f32 %v1091_v57, %v1027_v48  ;;  %v982_v8 = vmax.f32 %v963_v60, 1e-12  ;;  %v975_v52 = vmax.f32 %v949_v39, 1e-12  ;;  %v1672_v48 = vld [vmem:[%s2007_s29 + $0x18] sm:$0xff]  ;;  %1246 = vst [vmem:[%s2009_s28] sm:$0xff] (!%p1431_p12), %v2436_v18 }
 0x211   : > { %v1649_v4 = vpop.eup %1648  ;;  %1234 = vst [vmem:[%s2315_s14 + $0x40] sm:$0xff] %v1218_v16  ;;  %v2444_v47 = vadd.f32 %v1670_v54, %v1099_v24  ;;  %v1028_v5 = vmul.f32 %v1647_v31, %v2344_v19  ;;  %v1086_v57 = vsub.f32 1.0, %v2260_v3  ;;  %v2649_v24 = vld [vmem:[#allocation21_spill] sm:$0xff] }
 0x212   : > { %1226 = vst [vmem:[%s2315_s14] sm:$0xff] %v1210_v42  ;;  %v2450_v40 = vadd.f32 %v1107_v46, %v2128_v38  ;;  %v1020_v27 = vmul.f32 %v1649_v4, %v2346_v25  ;;  %1656 = vrcp.f32 %v982_v8  ;;  %v1093_v60 = vsub.f32 1.0, %v2649_v24  ;;  %v2650_v4 = vld [vmem:[#allocation22_spill] sm:$0xff] }
 0x213   : > { %v1211_v9 = vmul.f32 %v2403_v15, %v2444_v47  ;;  %v1108_v53 = vmul.f32 %v1092_v17, %v1028_v5  ;;  %1658 = vrcp.f32 %v975_v52  ;;  %v951_v50 = vpop.xlane.xlu1 %950  ;;  %v965_v32 = vpop.xlane.xlu0 %964  ;;  %v1671_v15 = vld [vmem:[%s2007_s29 + $0x10] sm:$0xff]  ;;  %v1094_v17 = vsub.f32 1.0, %v2650_v4  ;;  %1247 = vst [vmem:[%s2009_s28 + $0x8] sm:$0xff] (!%p1431_p12), %v2444_v47 }
 0x214   : > { %v1651_v19 = vpop.eup %1650  ;;  %v1219_v61 = vmul.f32 %v2415_v41, %v2450_v40  ;;  %v1100_v49 = vmul.f32 %v1084_v36, %v1020_v27  ;;  %v976_v29 = vmax.f32 %v951_v50, 1e-12  ;;  %v983_v38 = vmax.f32 %v965_v32, 1e-12  ;;  %v2651_v5 = vld [vmem:[#allocation18_spill] sm:$0xff]  ;;  %1255 = vst [vmem:[%s2009_s28 + $0x48] sm:$0xff] (!%p1431_p12), %v2450_v40 }
 0x215   : > { %1227 = vst [vmem:[%s2315_s14 + $0x8] sm:$0xff] %v1211_v9  ;;  %v2460_v25 = vadd.f32 %v1108_v53, %v2139_v43  ;;  %v1021_v34 = vmul.f32 %v1651_v19, %v2354_v59  ;;  %v1087_v36 = vsub.f32 1.0, %v2651_v5 }
 0x216   : > { %1235 = vst [vmem:[%s2315_s14 + $0x48] sm:$0xff] %v1219_v61  ;;  %v2465_v62 = vadd.f32 %v1671_v15, %v1100_v49  ;;  %1660 = vrcp.f32 %v976_v29  ;;  %v2653_v49 = vld [vmem:[#allocation19_spill] sm:$0xff] }
 0x217   : > { %v1220_v41 = vmul.f32 %v2417_v30, %v2460_v25  ;;  %v1101_v63 = vmul.f32 %v1085_v26, %v1021_v34  ;;  %1662 = vrcp.f32 %v983_v38  ;;  %v967_v2 = vpop.xlane.xlu1 %966  ;;  %v953_v11 = vpop.xlane.xlu0 %952  ;;  %v1088_v29 = vsub.f32 1.0, %v2653_v49  ;;  %v2654_v38 = vld [vmem:[#allocation17_spill] sm:$0xff]  ;;  %v2655_v34 = vld [vmem:[#allocation23_spill] sm:$0xff]  ;;  %1256 = vst [vmem:[%s2009_s28 + $0x50] sm:$0xff] (!%p1431_p12), %v2460_v25 }
 0x218   : > { %v1653_v23 = vpop.eup %1652  ;;  %v1212_v43 = vmul.f32 %v2401_v13, %v2465_v62  ;;  %v984_v59 = vmax.f32 %v967_v2, 1e-12  ;;  %v977_v0 = vmax.f32 %v953_v11, 1e-12  ;;  %v1095_v15 = vsub.f32 1.0, %v2655_v34  ;;  %1248 = vst [vmem:[%s2009_s28 + $0x10] sm:$0xff] (!%p1431_p12), %v2465_v62 }
 0x219   : > { %v1655_v7 = vpop.eup %1654  ;;  %1236 = vst [vmem:[%s2315_s14 + $0x50] sm:$0xff] %v1220_v41  ;;  %v2474_v16 = vadd.f32 %v1672_v48, %v1101_v63  ;;  %v1022_v30 = vmul.f32 %v1653_v23, %v2366_v51  ;;  %v1673_v51 = vld [vmem:[%s2007_s29 + $0x20] sm:$0xff] }
 0x21a   : > { %1228 = vst [vmem:[%s2315_s14 + $0x10] sm:$0xff] %v1212_v43  ;;  %v1029_v39 = vmul.f32 %v1655_v7, %v2361_v45  ;;  %1664 = vrcp.f32 %v984_v59 }
 0x21b   : > { %v1213_v13 = vmul.f32 %v2405_v22, %v2474_v16  ;;  %v1102_v31 = vmul.f32 %v1086_v57, %v1022_v30  ;;  %1666 = vrcp.f32 %v977_v0  ;;  %v969_v3 = vpop.xlane.xlu0 %968  ;;  %v2652_v22 = vld [vmem:[#allocation16_spill] sm:$0xff]  ;;  %1249 = vst [vmem:[%s2009_s28 + $0x18] sm:$0xff] (!%p1431_p12), %v2474_v16 }
 0x21c   : > { %v1657_v42 = vpop.eup %1656  ;;  %v1109_v46 = vmul.f32 %v1093_v60, %v1029_v39  ;;  %v985_v8 = vmax.f32 %v969_v3, 1e-12  ;;  %v2656_v0 = vld [vmem:[#allocation24_spill] sm:$0xff] }
 0x21d   : > { %v1659_v52 = vpop.eup %1658  ;;  %1229 = vst [vmem:[%s2315_s14 + $0x18] sm:$0xff] %v1213_v13  ;;  %v2485_v54 = vadd.f32 %v1673_v51, %v1102_v31  ;;  %v1030_v45 = vmul.f32 %v1657_v42, %v2370_v6  ;;  %v1096_v7 = vsub.f32 1.0, %v2656_v0  ;;  %v2657_v30 = vld [vmem:[#allocation20_spill] sm:$0xff]  ;;  %v2658_v42 = vld [vmem:[#allocation25_spill] sm:$0xff] }
 0x21e   : > { %v2490_v27 = vadd.f32 %v1109_v46, %v2652_v22  ;;  %v1023_v9 = vmul.f32 %v1659_v52, %v2375_v10  ;;  %1668 = vrcp.f32 %v985_v8  ;;  %v1677_v8 = vld [vmem:[%s2007_s29 + $0x70] sm:$0xff] }
 0x21f   : > { %v1214_v53 = vmul.f32 %v2407_v56, %v2485_v54  ;;  %v1110_v50 = vmul.f32 %v1094_v17, %v1030_v45  ;;  %v1674_v56 = vld [vmem:[%s2007_s29 + $0x28] sm:$0xff]  ;;  %1250 = vst [vmem:[%s2009_s28 + $0x20] sm:$0xff] (!%p1431_p12), %v2485_v54 }
 0x220   : > { %v1661_v32 = vpop.eup %1660  ;;  %v1221_v19 = vmul.f32 %v2419_v35, %v2490_v27  ;;  %v1103_v61 = vmul.f32 %v1087_v36, %v1023_v9  ;;  %v1208_v36 = vpop.permute.xlu1 %1207  ;;  %1257 = vst [vmem:[%s2009_s28 + $0x58] sm:$0xff] (!%p1431_p12), %v2490_v27 }
 0x221   : > { %v1663_v6 = vpop.eup %1662  ;;  %1230 = vst [vmem:[%s2315_s14 + $0x20] sm:$0xff] %v1214_v53  ;;  %v1126_v26 = vadd.f32 %v1110_v50, %v2654_v38  ;;  %v1024_v10 = vmul.f32 %v1661_v32, %v2386_v21  ;;  %v1675_v21 = vld [vmem:[%s2007_s29 + $0x30] sm:$0xff] }
 0x222   : > { %1237 = vst [vmem:[%s2315_s14 + $0x58] sm:$0xff] %v1221_v19  ;;  %v1119_v41 = vadd.f32 %v1674_v56, %v1103_v61  ;;  %v1031_v35 = vmul.f32 %v1663_v6, %v2381_v28  ;;  %v1089_v28 = vsub.f32 1.0, %v2657_v30 }
 0x223   : > { %v1222_v63 = vmul.f32 %v2421_v14, %v1126_v26  ;;  %v1104_v2 = vmul.f32 %v1088_v29, %v1024_v10  ;;  %v1676_v14 = vld [vmem:[%s2007_s29 + $0x68] sm:$0xff]  ;;  %1258 = vst [vmem:[%s2009_s28 + $0x60] sm:$0xff] (!%p1431_p12), %v1126_v26 }
 0x224   : > { %v1665_v11 = vpop.eup %1664  ;;  %v1215_v23 = vmul.f32 %v2409_v12, %v1119_v41  ;;  %v1111_v43 = vmul.f32 %v1095_v15, %v1031_v35  ;;  %1251 = vst [vmem:[%s2009_s28 + $0x28] sm:$0xff] (!%p1431_p12), %v1119_v41 }
 0x225   : > { %v1667_v59 = vpop.eup %1666  ;;  %1238 = vst [vmem:[%s2315_s14 + $0x60] sm:$0xff] %v1222_v63  ;;  %v1120_v57 = vadd.f32 %v1675_v21, %v1104_v2  ;;  %v1032_v48 = vmul.f32 %v1665_v11, %v2390_v44  ;;  %v1097_v44 = vsub.f32 1.0, %v2658_v42 }
 0x226   : > { %1231 = vst [vmem:[%s2315_s14 + $0x28] sm:$0xff] %v1215_v23  ;;  %v1127_v24 = vadd.f32 %v1676_v14, %v1111_v43  ;;  %v1025_v12 = vmul.f32 %v1667_v59, %v2392_v33  ;;  %v1678_v33 = vld [vmem:[%s2007_s29 + $0x38] sm:$0xff] }
 0x227   : > { %v1216_v60 = vmul.f32 %v2411_v58, %v1120_v57  ;;  %v1112_v39 = vmul.f32 %v1096_v7, %v1032_v48  ;;  %v1203_v58 = vpop.permute.xlu0 %1202  ;;  %1252 = vst [vmem:[%s2009_s28 + $0x30] sm:$0xff] (!%p1431_p12), %v1120_v57 }
 0x228   : > { %v1669_v13 = vpop.eup %1668  ;;  %v1223_v31 = vmul.f32 %v2423_v37, %v1127_v24  ;;  %v1105_v3 = vmul.f32 %v1089_v28, %v1025_v12  ;;  %v1679_v37 = vld [vmem:[%s2007_s29 + $0x78] sm:$0xff]  ;;  %1259 = vst [vmem:[%s2009_s28 + $0x68] sm:$0xff] (!%p1431_p12), %v1127_v24 }
 0x229   : > { %1232 = vst [vmem:[%s2315_s14 + $0x30] sm:$0xff] %v1216_v60  ;;  %v1033_v46 = vmul.f32 %v1669_v13, %v2396_v55  ;;  %v1128_v52 = vadd.f32 %v1677_v8, %v1112_v39 }
 0x22a   : > { %1239 = vst [vmem:[%s2315_s14 + $0x68] sm:$0xff] %v1223_v31  ;;  %v1121_v4 = vadd.f32 %v1678_v33, %v1105_v3 }
 0x22b   : > { %v1113_v17 = vmul.f32 %v1097_v44, %v1033_v46  ;;  %v1224_v51 = vmul.f32 %v1203_v58, %v1128_v52  ;;  %1245 = sbr.rel (%p1431_p12) target bundleno = 562 (0x232), region = 86  ;;  %1260 = vst [vmem:[%s2009_s28 + $0x70] sm:$0xff] (!%p1431_p12), %v1128_v52 }
 0x22c   : > { %v1217_v45 = vmul.f32 %v2413_v20, %v1121_v4  ;;  %1253 = vst [vmem:[%s2009_s28 + $0x38] sm:$0xff] (!%p1431_p12), %v1121_v4 }
 0x22d   : > { %v1129_v5 = vadd.f32 %v1679_v37, %v1113_v17  ;;  %1240 = vst [vmem:[%s2315_s14 + $0x70] sm:$0xff] %v1224_v51 }
 0x22e   : > { %1233 = vst [vmem:[%s2315_s14 + $0x38] sm:$0xff] %v1217_v45 }
 0x22f   : > { %v1225_v22 = vmul.f32 %v1208_v36, %v1129_v5  ;;  %1261 = vst [vmem:[%s2009_s28 + $0x78] sm:$0xff] (!%p1431_p12), %v1129_v5 }
 0x231   : > { %1241 = vst [vmem:[%s2315_s14 + $0x78] sm:$0xff] %v1225_v22 }
 0x232 PF: > { %s1440_s22 = sshll.u32 %s1794_s21, 11  ;;  %s1276_s24 = sshll.u32 %s2009_s28, 4  ;;  %s2561_s24 = int_to_ptr.vmem [resolvable:$true] %s1276_s24 }
 0x233   : > { %s2558_s9 = scalar_lea.hbm %s2620_s5, %s1440_s22  ;;  %s1263_s13 = scalar_lea.sflag [#allocation7], %s1980_s26 }
 0x234   : > { %s1710_s1 = scalar_lea.vmem %s2561_s24, 2048  ;;  %p2659_p5 = scmp.ne.s32.totalorder %s2633_s10, 0 }
 0x235   : > { %p1711_p2 = scmp.ne.s32.totalorder %s2561_s24, %s1710_s1  ;;  %s1816_s27 = smov [#allocation8]  }
 0x236   : > { %s1714_s6 = sshll.u32 %s1816_s27, 4  ;;  %s1715_s6 = int_to_ptr.vmem [resolvable:$false] %s1714_s6 }
 0x237   : > { %p1712_p3 = pnand %p1711_p2, %p2659_p5  ;;  %s1716_s21 = scalar_lea.vmem %s1715_s6, 4096 }
 0x238   : > { %p1717_p9 = scmp.lt.s32.totalorder %s2561_s24, %s1715_s6  ;;  %p1718_p1 = scmp.lt.s32.totalorder %s1716_s21, %s1710_s1 }
 0x239   : > { %p1713_p7 = pneg %p1712_p3 }
 0x23a   : > { %p1719_p4 = por %p1718_p1, %p1717_p9 }
 0x23c   : > { %p1720_p6 = pnand %p1719_p4, %p1713_p7 }
 0x23e   : > { %1723 = shalt.err (!%p1720_p6)
}
 0x23f   : > { %s1724_s28 = scalar_lea.hbm %s2558_s9, 2048  ;;  %s1728_s0 = scalar_lea.hbm %s2620_s5, 4096 }
 0x240   : > { %p1725_p11 = scmp.ne.s32.totalorder %s2558_s9, %s1724_s28  ;;  %p1729_p10 = scmp.lt.u32.totalorder %s2558_s9, %s2620_s5 }
 0x241   : > { %p1730_p8 = scmp.lt.u32.totalorder %s1728_s0, %s1724_s28  ;;  %p1732_p2 = scmp.lt.u32.totalorder %s1724_s28, %s2558_s9 }
 0x242   : > { %p1726_p13 = pnand %p1725_p11, %p2659_p5 }
 0x243   : > { %p1731_p12 = por %p1730_p8, %p1729_p10 }
 0x244   : > { %p1727_p0 = pneg %p1726_p13 }
 0x245   : > { %p1733_p3 = por %p1732_p2, %p1731_p12 }
 0x247   : > { %p1734_p7 = pnand %p1733_p3, %p1727_p0 }
 0x249   : > { %1737 = shalt.err (!%p1734_p7)
}
 0x24a   : > { %s1817_s15 = smov 128   ;;  %s1818_s14 = smov 8  }
 0x24b   : > { %1523 = dma.vmem_to_hbm [thread:$0]  (%p2659_p5), %s2561_s24, 2048, %s2558_s9, %s1263_s13, %s1817_s15, %s1817_s15, %s1818_s14  }
 0x24c PF: > { %p1534_p9 = scmp.ge.s32.totalorder %s1810_s25, 2  ;;  %s1291_s22 = sand.u32 1, %s1782_s18  }
 0x24d   : > { %p2660_p1 = scmp.ne.s32.totalorder %s2634_s11, 0  ;;  %s1292_s29 = scalar_lea.sflag [#allocation7], %s1291_s22 }
 0x24f   : > { %p1530_p4 = pnand %p1534_p9, %p2660_p1 }
 0x251   : > { %1777 = dma.done.wait (!%p1530_p4), %s1292_s29, 2048  }
 0x252   : > { %1779 = vsyncadd (!%p1530_p4), %s1292_s29, 4294965248  ;;  %s21_s25 = sadd.s32 1, %s1810_s25   ;;  %s2661_s22 = sld [smem:[#allocation13_spill]] }
 0x253   : > { %p18_p6 = scmp.ge.s32.totalorder %s21_s25, 8   ;;  %s2662_s10 = sld [smem:[#allocation14_spill]] }
 0x254   : > { %s2663_s24 = sld [smem:[#allocation15_spill]]  ;;  %s2664_s18 = smov %s1786_s19 }
 0x255   : > { %s2665_s19 = smov %s1790_s20  ;;  %s2666_s20 = smov %s1914_s8 }
 0x256   : > { %s2667_s21 = smov %s1802_s23  ;;  %20 = sbr.rel (!%p18_p6) target bundleno = 10 (0xa), region = 145 }
 0x259   : > { %s2668_s23 = smov %s2662_s10 }
 0x25d   :  { %1297 = vsyncpa [#allocation6], 1 }
 0x25e   :  { %1299 = vsyncpa [#allocation6 + $0x1], 1 }
 0x25f   :  { %1300 = vsyncpa [#allocation7], 1 }
 0x260   :  { %1302 = vsyncpa [#allocation7 + $0x1], 1 }
 0x261   :  { %1303 = vsyncmov [#allocation4] }
 0x264   :  { %s1304_s11 = vpop.sfrf %1303 }
 0x265   :  { %p1437_p5 = scmp.ne.s32.totalorder %s1304_s11, 0 }
 0x267   :  { %1308 = shalt.err (%p1437_p5)  }

</bundles_post_ra>
